<compile_context>
chip_gen: v7x
topology: tpu7x:2x2x1
jax: 0.10.0
libtpu: 0.0.40
codegen_flags: <defaults>
</compile_context>

<pallas_src>
import functools

import jax
import jax.numpy as jnp
import numpy as np
from jax.experimental import pallas as pl
from jax.experimental.pallas import tpu as pltpu


def mask_bigru_kernel(Tc, H,
                      gi_f_ref, gi_b_ref, m_f_ref, m_b_ref,
                      whh1_ref, bhh1n_ref, whh2_ref, bhh2n_ref,
                      out_f_ref, out_b_ref, h_final_ref,
                      h1_scr, h2_scr):
    c = pl.program_id(0)
    nc = pl.num_programs(0)

    @pl.when(c == 0)
    def _():
        h1_scr[...] = jnp.zeros_like(h1_scr)
        h2_scr[...] = jnp.zeros_like(h2_scr)

    whh1_t = whh1_ref[...]          # (H, 3H)
    bhh1_n = bhh1n_ref[...]         # (1, H)
    whh2_t = whh2_ref[...]
    bhh2_n = bhh2n_ref[...]

    def step(gi, m, h, whh_t, bhh_n):
        # gi already contains x@W_ih^T + b_ih (+ b_hh for the r/z thirds).
        gh = jnp.dot(h, whh_t, preferred_element_type=jnp.float32)   # (B, 3H)
        r = jax.nn.sigmoid(gi[:, 0:H] + gh[:, 0:H])
        z = jax.nn.sigmoid(gi[:, H:2 * H] + gh[:, H:2 * H])
        n = jnp.tanh(gi[:, 2 * H:3 * H] + r * (gh[:, 2 * H:3 * H] + bhh_n))
        h_t = (1.0 - z) * n + z * h
        masked = h_t * m                       # reused for out and blend
        h_new = masked + h * (1.0 - m)
        return masked, h_new

    # ---- forward direction: chunk c, increasing time inside the chunk ----
    def fwd_body(s, h):
        masked, h_new = step(gi_f_ref[s], m_f_ref[s], h, whh1_t, bhh1_n)
        out_f_ref[s] = masked.astype(out_f_ref.dtype)
        return h_new

    h1_scr[...] = jax.lax.fori_loop(0, Tc, fwd_body, h1_scr[...], unroll=True)

    # ---- backward direction: chunk Nc-1-c, decreasing time inside ----
    def bwd_body(j, h):
        s = Tc - 1 - j
        masked, h_new = step(gi_b_ref[s], m_b_ref[s], h, whh2_t, bhh2_n)
        out_b_ref[s] = masked.astype(out_b_ref.dtype)
        return h_new

    h2_scr[...] = jax.lax.fori_loop(0, Tc, bwd_body, h2_scr[...], unroll=True)

    # final hidden: only written (and flushed) after the last grid step
    @pl.when(c == nc - 1)
    def _():
        h_final_ref[0] = h1_scr[...].astype(h_final_ref.dtype)
        h_final_ref[1] = h2_scr[...].astype(h_final_ref.dtype)


def mask_bigru(seq_input, seq_mask, params, *, time_chunk=8):
    """params = (wih1 (3H,D), whh1 (3H,H), bih1 (3H,), bhh1 (3H,),
                 wih2, whh2, bih2, bhh2).  Returns (outputs (T,B,2H), hidden (2,B,H))."""
    wih1, whh1, bih1, bhh1, wih2, whh2, bih2, bhh2 = params
    T, B, D = seq_input.shape
    H = whh1.shape[1]

    Tc = max(1, min(time_chunk, T))
    num_chunks = pl.cdiv(T, Tc)
    T_pad = num_chunks * Tc

    x = seq_input.astype(jnp.float32)
    mask = seq_mask.astype(jnp.float32)

    def folded_bias(bih, bhh):
        # Fold b_hh into b_ih for the r/z gate thirds; the n-gate hidden bias
        # must stay inside the recurrence: n = tanh(i_n + r * (h_n + bhh_n)).
        bih = bih.astype(jnp.float32)
        bhh = bhh.astype(jnp.float32)
        return bih.at[:2 * H].add(bhh[:2 * H])

    # Hoisted input projections: one large (T*B, D) @ (D, 3H) matmul/direction.
    gi_f = jnp.einsum('tbd,gd->tbg', x, wih1.astype(jnp.float32)) \
        + folded_bias(bih1, bhh1)[None, None, :]
    gi_b = jnp.einsum('tbd,gd->tbg', x, wih2.astype(jnp.float32)) \
        + folded_bias(bih2, bhh2)[None, None, :]

    pad = T_pad - T
    if pad:
        gi_f = jnp.pad(gi_f, ((0, pad), (0, 0), (0, 0)))
        gi_b = jnp.pad(gi_b, ((0, pad), (0, 0), (0, 0)))
        mask = jnp.pad(mask, ((0, pad), (0, 0)))       # mask=0 => no-op steps
    mask3 = mask[:, :, None]                           # (T_pad, B, 1)

    whh1_t = whh1.T.astype(jnp.float32)                # (H, 3H)
    whh2_t = whh2.T.astype(jnp.float32)
    bhh1_n = bhh1[2 * H:].reshape(1, H).astype(jnp.float32)
    bhh2_n = bhh2[2 * H:].reshape(1, H).astype(jnp.float32)

    grid_spec = pltpu.PrefetchScalarGridSpec(
        num_scalar_prefetch=0,
        grid=(num_chunks,),
        in_specs=[
            pl.BlockSpec((Tc, B, 3 * H), lambda c: (c, 0, 0)),                   # Gi fwd
            pl.BlockSpec((Tc, B, 3 * H), lambda c: (num_chunks - 1 - c, 0, 0)),  # Gi bwd
            pl.BlockSpec((Tc, B, 1), lambda c: (c, 0, 0)),                       # mask fwd
            pl.BlockSpec((Tc, B, 1), lambda c: (num_chunks - 1 - c, 0, 0)),      # mask bwd
            pl.BlockSpec((H, 3 * H), lambda c: (0, 0)),                          # W_hh1^T
            pl.BlockSpec((1, H), lambda c: (0, 0)),                              # b_hh1[n]
            pl.BlockSpec((H, 3 * H), lambda c: (0, 0)),                          # W_hh2^T
            pl.BlockSpec((1, H), lambda c: (0, 0)),                              # b_hh2[n]
        ],
        out_specs=[
            pl.BlockSpec((Tc, B, H), lambda c: (c, 0, 0)),                       # fwd outs
            pl.BlockSpec((Tc, B, H), lambda c: (num_chunks - 1 - c, 0, 0)),      # bwd outs
            pl.BlockSpec((2, B, H), lambda c: (0, 0, 0)),                        # final h
        ],
        scratch_shapes=[pltpu.VMEM((B, H), jnp.float32),
                        pltpu.VMEM((B, H), jnp.float32)],
    )

    out_f, out_b, h_final = pl.pallas_call(
        functools.partial(mask_bigru_kernel, Tc, H),
        grid_spec=grid_spec,
        out_shape=(
            jax.ShapeDtypeStruct((T_pad, B, H), jnp.float32),
            jax.ShapeDtypeStruct((T_pad, B, H), jnp.float32),
            jax.ShapeDtypeStruct((2, B, H), jnp.float32),
        ),
        compiler_params=pltpu.CompilerParams(
            dimension_semantics=("arbitrary",),        # recurrent chunk axis
            vmem_limit_bytes=32 * 1024 * 1024,
        ),
    )(gi_f, gi_b, mask3, mask3, whh1_t, bhh1_n, whh2_t, bhh2_n)

    outputs = jnp.concatenate([out_f[:T], out_b[:T]], axis=2)   # (T, B, 2H)
    return outputs, h_final


# ---------------- pure-JAX reference (mirrors the PyTorch forward) -----------
def mask_bigru_ref(seq_input, seq_mask, params):
    wih1, whh1, bih1, bhh1, wih2, whh2, bih2, bhh2 = params
    T, B, D = seq_input.shape
    H = whh1.shape[1]

    def cell(x, h, wih, whh, bih, bhh):
        gi = x @ wih.T + bih
        gh = h @ whh.T + bhh
        i_r, i_z, i_n = jnp.split(gi, 3, axis=1)
        h_r, h_z, h_n = jnp.split(gh, 3, axis=1)
        r = jax.nn.sigmoid(i_r + h_r)
        z = jax.nn.sigmoid(i_z + h_z)
        n = jnp.tanh(i_n + r * h_n)
        return (1.0 - z) * n + z * h

    h1 = jnp.zeros((B, H), jnp.float32)
    h2 = jnp.zeros((B, H), jnp.float32)
    outs1, outs2 = [], []
    for t in range(T):
        ht = cell(seq_input[t], h1, wih1, whh1, bih1, bhh1)
        m = seq_mask[t][:, None]
        h1 = ht * m + h1 * (1.0 - m)
        outs1.append(ht * m)
    for t in range(T - 1, -1, -1):
        ht = cell(seq_input[t], h2, wih2, whh2, bih2, bhh2)
        m = seq_mask[t][:, None]
        h2 = ht * m + h2 * (1.0 - m)
        outs2.append(ht * m)
    hidden = jnp.stack([h1, h2], 0)
    outputs = jnp.stack(
        [jnp.concatenate([outs1[t], outs2[T - 1 - t]], axis=1)
         for t in range(T)])
    return outputs, hidden


if __name__ == "__main__":
    T, B = 8, 8
    input_size, hidden_size = 16, 32
    H = hidden_size // 2                     # per-direction hidden

    key = jax.random.PRNGKey(0)
    keys = jax.random.split(key, 11)

    # nn.GRUCell.reset_parameters(): uniform(-1/sqrt(H), 1/sqrt(H))
    k = 1.0 / np.sqrt(H)

    def u(kk, shape):
        return jax.random.uniform(kk, shape, jnp.float32, -k, k)

    params = (
        u(keys[0], (3 * H, input_size)),     # gru_c1 weight_ih
        u(keys[1], (3 * H, H)),              # gru_c1 weight_hh
        u(keys[2], (3 * H,)),                # gru_c1 bias_ih
        u(keys[3], (3 * H,)),                # gru_c1 bias_hh
        u(keys[4], (3 * H, input_size)),     # gru_c2 weight_ih
        u(keys[5], (3 * H, H)),              # gru_c2 weight_hh
        u(keys[6], (3 * H,)),                # gru_c2 bias_ih
        u(keys[7], (3 * H,)),                # gru_c2 bias_hh
    )

    seq_input = jax.random.normal(keys[8], (T, B, input_size), jnp.float32)
    seq_mask = jax.random.bernoulli(keys[9], 0.7, (T, B)).astype(jnp.float32)

    out_ref, hid_ref = mask_bigru_ref(seq_input, seq_mask, params)

    # Case 1: time_chunk divides T (exercises cross-chunk hidden carry).
    outputs, hidden = mask_bigru(seq_input, seq_mask, params, time_chunk=4)
    jax.block_until_ready((outputs, hidden))
    np.testing.assert_allclose(np.asarray(outputs), np.asarray(out_ref),
                               atol=2e-4, rtol=2e-4)
    np.testing.assert_allclose(np.asarray(hidden), np.asarray(hid_ref),
                               atol=2e-4, rtol=2e-4)
    assert outputs.shape == (T, B, hidden_size)
    assert hidden.shape == (2, B, H)

    # Case 2: time_chunk does NOT divide T (exercises the zero-mask padding).
    outputs2, hidden2 = mask_bigru(seq_input, seq_mask, params, time_chunk=3)
    jax.block_until_ready((outputs2, hidden2))
    np.testing.assert_allclose(np.asarray(outputs2), np.asarray(out_ref),
                               atol=2e-4, rtol=2e-4)
    np.testing.assert_allclose(np.asarray(hidden2), np.asarray(hid_ref),
                               atol=2e-4, rtol=2e-4)

    print("KERNEL_OK")
</pallas_src>

<mosaic_0001>
module attributes {stable_mosaic.version = 11 : i64} {
  func.func @mask_bigru_kernel(%arg0: i32, %arg1: memref<4x8x48xf32, #tpu.memory_space<vmem>>, %arg2: memref<4x8x48xf32, #tpu.memory_space<vmem>>, %arg3: memref<4x8x1xf32, #tpu.memory_space<vmem>>, %arg4: memref<4x8x1xf32, #tpu.memory_space<vmem>>, %arg5: memref<16x48xf32, #tpu.memory_space<vmem>>, %arg6: memref<1x16xf32, #tpu.memory_space<vmem>>, %arg7: memref<16x48xf32, #tpu.memory_space<vmem>>, %arg8: memref<1x16xf32, #tpu.memory_space<vmem>>, %arg9: memref<4x8x16xf32, #tpu.memory_space<vmem>>, %arg10: memref<4x8x16xf32, #tpu.memory_space<vmem>>, %arg11: memref<2x8x16xf32, #tpu.memory_space<vmem>>, %arg12: memref<8x16xf32, #tpu.memory_space<vmem>>, %arg13: memref<8x16xf32, #tpu.memory_space<vmem>>) attributes {dimension_semantics = [#tpu.dimension_semantics<arbitrary>], iteration_bounds = array<i64: 2>, scalar_prefetch = 0 : i64, scratch_operands = 2 : i64, tpu.core_type = #tpu.core_type<tc>, window_params = [{transform_indices = @transform_0, window_bounds = array<i64: 4, 8, 48>}, {transform_indices = @transform_1, window_bounds = array<i64: 4, 8, 48>}, {transform_indices = @transform_2, window_bounds = array<i64: 4, 8, 1>}, {transform_indices = @transform_3, window_bounds = array<i64: 4, 8, 1>}, {pipeline_mode = #tpu.pipeline_mode<synchronous>, transform_indices = @transform_4, window_bounds = array<i64: 16, 48>}, {pipeline_mode = #tpu.pipeline_mode<synchronous>, transform_indices = @transform_5, window_bounds = array<i64: 1, 16>}, {pipeline_mode = #tpu.pipeline_mode<synchronous>, transform_indices = @transform_6, window_bounds = array<i64: 16, 48>}, {pipeline_mode = #tpu.pipeline_mode<synchronous>, transform_indices = @transform_7, window_bounds = array<i64: 1, 16>}, {transform_indices = @transform_8, window_bounds = array<i64: 4, 8, 16>}, {transform_indices = @transform_9, window_bounds = array<i64: 4, 8, 16>}, {pipeline_mode = #tpu.pipeline_mode<synchronous>, transform_indices = @transform_10, window_bounds = array<i64: 2, 8, 16>}]} {
    %c0_i32 = arith.constant 0 : i32
    %0 = arith.cmpi eq, %arg0, %c0_i32 : i32
    %1 = arith.extui %0 : i1 to i32
    %c0_i32_0 = arith.constant 0 : i32
    %2 = arith.cmpi ne, %1, %c0_i32_0 : i32
    scf.if %2 {
      %cst_115 = arith.constant 0.000000e+00 : f32
      %386 = vector.broadcast %cst_115 : f32 to vector<8x16xf32>
      %c0_116 = arith.constant 0 : index
      %c0_117 = arith.constant 0 : index
      %387 = vector.load %arg12[%c0_116, %c0_117] : memref<8x16xf32, #tpu.memory_space<vmem>>, vector<8x16xf32>
      tpu.vector_store %arg12[%c0_116, %c0_117], %386 {strides = array<i32>} : memref<8x16xf32, #tpu.memory_space<vmem>>, vector<8x16xf32>,
      %cst_118 = arith.constant 0.000000e+00 : f32
      %388 = vector.broadcast %cst_118 : f32 to vector<8x16xf32>
      %c0_119 = arith.constant 0 : index
      %c0_120 = arith.constant 0 : index
      %389 = vector.load %arg13[%c0_119, %c0_120] : memref<8x16xf32, #tpu.memory_space<vmem>>, vector<8x16xf32>
      tpu.vector_store %arg13[%c0_119, %c0_120], %388 {strides = array<i32>} : memref<8x16xf32, #tpu.memory_space<vmem>>, vector<8x16xf32>,
    } else {
    }
    %c0 = arith.constant 0 : index
    %c0_1 = arith.constant 0 : index
    %3 = vector.load %arg5[%c0, %c0_1] : memref<16x48xf32, #tpu.memory_space<vmem>>, vector<16x48xf32>
    %c0_2 = arith.constant 0 : index
    %c0_3 = arith.constant 0 : index
    %4 = vector.load %arg6[%c0_2, %c0_3] : memref<1x16xf32, #tpu.memory_space<vmem>>, vector<1x16xf32>
    %c0_4 = arith.constant 0 : index
    %c0_5 = arith.constant 0 : index
    %5 = vector.load %arg7[%c0_4, %c0_5] : memref<16x48xf32, #tpu.memory_space<vmem>>, vector<16x48xf32>
    %c0_6 = arith.constant 0 : index
    %c0_7 = arith.constant 0 : index
    %6 = vector.load %arg8[%c0_6, %c0_7] : memref<1x16xf32, #tpu.memory_space<vmem>>, vector<1x16xf32>
    %c0_8 = arith.constant 0 : index
    %c0_9 = arith.constant 0 : index
    %7 = vector.load %arg12[%c0_8, %c0_9] : memref<8x16xf32, #tpu.memory_space<vmem>>, vector<8x16xf32>
    %c0_i32_10 = arith.constant 0 : i32
    %8 = arith.index_cast %c0_i32_10 : i32 to index
    %c0_11 = arith.constant 0 : index
    %c0_12 = arith.constant 0 : index
    %9 = vector.load %arg1[%8, %c0_11, %c0_12] : memref<4x8x48xf32, #tpu.memory_space<vmem>>, vector<1x8x48xf32>
    %10 = vector.shape_cast %9 : vector<1x8x48xf32> to vector<8x48xf32>
    %11 = arith.index_cast %c0_i32_10 : i32 to index
    %c0_13 = arith.constant 0 : index
    %c0_14 = arith.constant 0 : index
    %12 = vector.load %arg3[%11, %c0_13, %c0_14] : memref<4x8x1xf32, #tpu.memory_space<vmem>>, vector<1x8x1xf32>
    %13 = vector.shape_cast %12 : vector<1x8x1xf32> to vector<8x1xf32>
    %cst = arith.constant dense<0.000000e+00> : vector<8x48xf32>
    %14 = tpu.matmul %7, %3, %cst {dimension_numbers = #tpu.dot_dimension_numbers<[1], [0], [0], [1], [0, 0, 1, 1], [], []>} : vector<8x16xf32>, vector<16x48xf32>, vector<8x48xf32> -> vector<8x48xf32>
    %15 = vector.extract_strided_slice %10 {offsets = [0, 0], sizes = [8, 16], strides = [1, 1]} : vector<8x48xf32> to vector<8x16xf32>
    %16 = vector.extract_strided_slice %14 {offsets = [0, 0], sizes = [8, 16], strides = [1, 1]} : vector<8x48xf32> to vector<8x16xf32>
    %17 = arith.addf %15, %16 : vector<8x16xf32>
    %18 = arith.negf %17 : vector<8x16xf32>
    %19 = math.exp %18 : vector<8x16xf32>
    %cst_15 = arith.constant 1.000000e+00 : f32
    %20 = vector.broadcast %cst_15 : f32 to vector<8x16xf32>
    %21 = arith.addf %20, %19 : vector<8x16xf32>
    %22 = arith.divf %20, %21 : vector<8x16xf32>
    %23 = vector.extract_strided_slice %10 {offsets = [0, 16], sizes = [8, 16], strides = [1, 1]} : vector<8x48xf32> to vector<8x16xf32>
    %24 = vector.extract_strided_slice %14 {offsets = [0, 16], sizes = [8, 16], strides = [1, 1]} : vector<8x48xf32> to vector<8x16xf32>
    %25 = arith.addf %23, %24 : vector<8x16xf32>
    %26 = arith.negf %25 : vector<8x16xf32>
    %27 = math.exp %26 : vector<8x16xf32>
    %cst_16 = arith.constant 1.000000e+00 : f32
    %28 = vector.broadcast %cst_16 : f32 to vector<8x16xf32>
    %29 = arith.addf %28, %27 : vector<8x16xf32>
    %30 = arith.divf %28, %29 : vector<8x16xf32>
    %31 = vector.extract_strided_slice %10 {offsets = [0, 32], sizes = [8, 16], strides = [1, 1]} : vector<8x48xf32> to vector<8x16xf32>
    %32 = vector.extract_strided_slice %14 {offsets = [0, 32], sizes = [8, 16], strides = [1, 1]} : vector<8x48xf32> to vector<8x16xf32>
    %33 = vector.broadcast %4 : vector<1x16xf32> to vector<8x16xf32>
    %34 = arith.addf %32, %33 : vector<8x16xf32>
    %35 = arith.mulf %22, %34 : vector<8x16xf32>
    %36 = arith.addf %31, %35 : vector<8x16xf32>
    %37 = math.tanh %36 : vector<8x16xf32>
    %cst_17 = arith.constant 1.000000e+00 : f32
    %38 = vector.broadcast %cst_17 : f32 to vector<8x16xf32>
    %39 = arith.subf %38, %30 : vector<8x16xf32>
    %40 = arith.mulf %39, %37 : vector<8x16xf32>
    %41 = arith.mulf %30, %7 : vector<8x16xf32>
    %42 = arith.addf %40, %41 : vector<8x16xf32>
    %43 = vector.broadcast %13 : vector<8x1xf32> to vector<8x16xf32>
    %44 = arith.mulf %42, %43 : vector<8x16xf32>
    %cst_18 = arith.constant 1.000000e+00 : f32
    %45 = vector.broadcast %cst_18 : f32 to vector<8x1xf32>
    %46 = arith.subf %45, %13 : vector<8x1xf32>
    %47 = vector.broadcast %46 : vector<8x1xf32> to vector<8x16xf32>
    %48 = arith.mulf %7, %47 : vector<8x16xf32>
    %49 = arith.addf %44, %48 : vector<8x16xf32>
    %50 = arith.index_cast %c0_i32_10 : i32 to index
    %c0_19 = arith.constant 0 : index
    %c0_20 = arith.constant 0 : index
    %51 = vector.load %arg9[%50, %c0_19, %c0_20] : memref<4x8x16xf32, #tpu.memory_space<vmem>>, vector<1x8x16xf32>
    %52 = vector.shape_cast %51 : vector<1x8x16xf32> to vector<8x16xf32>
    %53 = vector.shape_cast %44 : vector<8x16xf32> to vector<1x8x16xf32>
    tpu.vector_store %arg9[%50, %c0_19, %c0_20], %53 {strides = array<i32>} : memref<4x8x16xf32, #tpu.memory_space<vmem>>, vector<1x8x16xf32>,
    %c1_i32 = arith.constant 1 : i32
    %54 = arith.index_cast %c1_i32 : i32 to index
    %c0_21 = arith.constant 0 : index
    %c0_22 = arith.constant 0 : index
    %55 = vector.load %arg1[%54, %c0_21, %c0_22] : memref<4x8x48xf32, #tpu.memory_space<vmem>>, vector<1x8x48xf32>
    %56 = vector.shape_cast %55 : vector<1x8x48xf32> to vector<8x48xf32>
    %57 = arith.index_cast %c1_i32 : i32 to index
    %c0_23 = arith.constant 0 : index
    %c0_24 = arith.constant 0 : index
    %58 = vector.load %arg3[%57, %c0_23, %c0_24] : memref<4x8x1xf32, #tpu.memory_space<vmem>>, vector<1x8x1xf32>
    %59 = vector.shape_cast %58 : vector<1x8x1xf32> to vector<8x1xf32>
    %cst_25 = arith.constant dense<0.000000e+00> : vector<8x48xf32>
    %60 = tpu.matmul %49, %3, %cst_25 {dimension_numbers = #tpu.dot_dimension_numbers<[1], [0], [0], [1], [0, 0, 1, 1], [], []>} : vector<8x16xf32>, vector<16x48xf32>, vector<8x48xf32> -> vector<8x48xf32>
    %61 = vector.extract_strided_slice %56 {offsets = [0, 0], sizes = [8, 16], strides = [1, 1]} : vector<8x48xf32> to vector<8x16xf32>
    %62 = vector.extract_strided_slice %60 {offsets = [0, 0], sizes = [8, 16], strides = [1, 1]} : vector<8x48xf32> to vector<8x16xf32>
    %63 = arith.addf %61, %62 : vector<8x16xf32>
    %64 = arith.negf %63 : vector<8x16xf32>
    %65 = math.exp %64 : vector<8x16xf32>
    %cst_26 = arith.constant 1.000000e+00 : f32
    %66 = vector.broadcast %cst_26 : f32 to vector<8x16xf32>
    %67 = arith.addf %66, %65 : vector<8x16xf32>
    %68 = arith.divf %66, %67 : vector<8x16xf32>
    %69 = vector.extract_strided_slice %56 {offsets = [0, 16], sizes = [8, 16], strides = [1, 1]} : vector<8x48xf32> to vector<8x16xf32>
    %70 = vector.extract_strided_slice %60 {offsets = [0, 16], sizes = [8, 16], strides = [1, 1]} : vector<8x48xf32> to vector<8x16xf32>
    %71 = arith.addf %69, %70 : vector<8x16xf32>
    %72 = arith.negf %71 : vector<8x16xf32>
    %73 = math.exp %72 : vector<8x16xf32>
    %cst_27 = arith.constant 1.000000e+00 : f32
    %74 = vector.broadcast %cst_27 : f32 to vector<8x16xf32>
    %75 = arith.addf %74, %73 : vector<8x16xf32>
    %76 = arith.divf %74, %75 : vector<8x16xf32>
    %77 = vector.extract_strided_slice %56 {offsets = [0, 32], sizes = [8, 16], strides = [1, 1]} : vector<8x48xf32> to vector<8x16xf32>
    %78 = vector.extract_strided_slice %60 {offsets = [0, 32], sizes = [8, 16], strides = [1, 1]} : vector<8x48xf32> to vector<8x16xf32>
    %79 = vector.broadcast %4 : vector<1x16xf32> to vector<8x16xf32>
    %80 = arith.addf %78, %79 : vector<8x16xf32>
    %81 = arith.mulf %68, %80 : vector<8x16xf32>
    %82 = arith.addf %77, %81 : vector<8x16xf32>
    %83 = math.tanh %82 : vector<8x16xf32>
    %cst_28 = arith.constant 1.000000e+00 : f32
    %84 = vector.broadcast %cst_28 : f32 to vector<8x16xf32>
    %85 = arith.subf %84, %76 : vector<8x16xf32>
    %86 = arith.mulf %85, %83 : vector<8x16xf32>
    %87 = arith.mulf %76, %49 : vector<8x16xf32>
    %88 = arith.addf %86, %87 : vector<8x16xf32>
    %89 = vector.broadcast %59 : vector<8x1xf32> to vector<8x16xf32>
    %90 = arith.mulf %88, %89 : vector<8x16xf32>
    %cst_29 = arith.constant 1.000000e+00 : f32
    %91 = vector.broadcast %cst_29 : f32 to vector<8x1xf32>
    %92 = arith.subf %91, %59 : vector<8x1xf32>
    %93 = vector.broadcast %92 : vector<8x1xf32> to vector<8x16xf32>
    %94 = arith.mulf %49, %93 : vector<8x16xf32>
    %95 = arith.addf %90, %94 : vector<8x16xf32>
    %96 = arith.index_cast %c1_i32 : i32 to index
    %c0_30 = arith.constant 0 : index
    %c0_31 = arith.constant 0 : index
    %97 = vector.load %arg9[%96, %c0_30, %c0_31] : memref<4x8x16xf32, #tpu.memory_space<vmem>>, vector<1x8x16xf32>
    %98 = vector.shape_cast %97 : vector<1x8x16xf32> to vector<8x16xf32>
    %99 = vector.shape_cast %90 : vector<8x16xf32> to vector<1x8x16xf32>
    tpu.vector_store %arg9[%96, %c0_30, %c0_31], %99 {strides = array<i32>} : memref<4x8x16xf32, #tpu.memory_space<vmem>>, vector<1x8x16xf32>,
    %c2_i32 = arith.constant 2 : i32
    %100 = arith.index_cast %c2_i32 : i32 to index
    %c0_32 = arith.constant 0 : index
    %c0_33 = arith.constant 0 : index
    %101 = vector.load %arg1[%100, %c0_32, %c0_33] : memref<4x8x48xf32, #tpu.memory_space<vmem>>, vector<1x8x48xf32>
    %102 = vector.shape_cast %101 : vector<1x8x48xf32> to vector<8x48xf32>
    %103 = arith.index_cast %c2_i32 : i32 to index
    %c0_34 = arith.constant 0 : index
    %c0_35 = arith.constant 0 : index
    %104 = vector.load %arg3[%103, %c0_34, %c0_35] : memref<4x8x1xf32, #tpu.memory_space<vmem>>, vector<1x8x1xf32>
    %105 = vector.shape_cast %104 : vector<1x8x1xf32> to vector<8x1xf32>
    %cst_36 = arith.constant dense<0.000000e+00> : vector<8x48xf32>
    %106 = tpu.matmul %95, %3, %cst_36 {dimension_numbers = #tpu.dot_dimension_numbers<[1], [0], [0], [1], [0, 0, 1, 1], [], []>} : vector<8x16xf32>, vector<16x48xf32>, vector<8x48xf32> -> vector<8x48xf32>
    %107 = vector.extract_strided_slice %102 {offsets = [0, 0], sizes = [8, 16], strides = [1, 1]} : vector<8x48xf32> to vector<8x16xf32>
    %108 = vector.extract_strided_slice %106 {offsets = [0, 0], sizes = [8, 16], strides = [1, 1]} : vector<8x48xf32> to vector<8x16xf32>
    %109 = arith.addf %107, %108 : vector<8x16xf32>
    %110 = arith.negf %109 : vector<8x16xf32>
    %111 = math.exp %110 : vector<8x16xf32>
    %cst_37 = arith.constant 1.000000e+00 : f32
    %112 = vector.broadcast %cst_37 : f32 to vector<8x16xf32>
    %113 = arith.addf %112, %111 : vector<8x16xf32>
    %114 = arith.divf %112, %113 : vector<8x16xf32>
    %115 = vector.extract_strided_slice %102 {offsets = [0, 16], sizes = [8, 16], strides = [1, 1]} : vector<8x48xf32> to vector<8x16xf32>
    %116 = vector.extract_strided_slice %106 {offsets = [0, 16], sizes = [8, 16], strides = [1, 1]} : vector<8x48xf32> to vector<8x16xf32>
    %117 = arith.addf %115, %116 : vector<8x16xf32>
    %118 = arith.negf %117 : vector<8x16xf32>
    %119 = math.exp %118 : vector<8x16xf32>
    %cst_38 = arith.constant 1.000000e+00 : f32
    %120 = vector.broadcast %cst_38 : f32 to vector<8x16xf32>
    %121 = arith.addf %120, %119 : vector<8x16xf32>
    %122 = arith.divf %120, %121 : vector<8x16xf32>
    %123 = vector.extract_strided_slice %102 {offsets = [0, 32], sizes = [8, 16], strides = [1, 1]} : vector<8x48xf32> to vector<8x16xf32>
    %124 = vector.extract_strided_slice %106 {offsets = [0, 32], sizes = [8, 16], strides = [1, 1]} : vector<8x48xf32> to vector<8x16xf32>
    %125 = vector.broadcast %4 : vector<1x16xf32> to vector<8x16xf32>
    %126 = arith.addf %124, %125 : vector<8x16xf32>
    %127 = arith.mulf %114, %126 : vector<8x16xf32>
    %128 = arith.addf %123, %127 : vector<8x16xf32>
    %129 = math.tanh %128 : vector<8x16xf32>
    %cst_39 = arith.constant 1.000000e+00 : f32
    %130 = vector.broadcast %cst_39 : f32 to vector<8x16xf32>
    %131 = arith.subf %130, %122 : vector<8x16xf32>
    %132 = arith.mulf %131, %129 : vector<8x16xf32>
    %133 = arith.mulf %122, %95 : vector<8x16xf32>
    %134 = arith.addf %132, %133 : vector<8x16xf32>
    %135 = vector.broadcast %105 : vector<8x1xf32> to vector<8x16xf32>
    %136 = arith.mulf %134, %135 : vector<8x16xf32>
    %cst_40 = arith.constant 1.000000e+00 : f32
    %137 = vector.broadcast %cst_40 : f32 to vector<8x1xf32>
    %138 = arith.subf %137, %105 : vector<8x1xf32>
    %139 = vector.broadcast %138 : vector<8x1xf32> to vector<8x16xf32>
    %140 = arith.mulf %95, %139 : vector<8x16xf32>
    %141 = arith.addf %136, %140 : vector<8x16xf32>
    %142 = arith.index_cast %c2_i32 : i32 to index
    %c0_41 = arith.constant 0 : index
    %c0_42 = arith.constant 0 : index
    %143 = vector.load %arg9[%142, %c0_41, %c0_42] : memref<4x8x16xf32, #tpu.memory_space<vmem>>, vector<1x8x16xf32>
    %144 = vector.shape_cast %143 : vector<1x8x16xf32> to vector<8x16xf32>
    %145 = vector.shape_cast %136 : vector<8x16xf32> to vector<1x8x16xf32>
    tpu.vector_store %arg9[%142, %c0_41, %c0_42], %145 {strides = array<i32>} : memref<4x8x16xf32, #tpu.memory_space<vmem>>, vector<1x8x16xf32>,
    %c3_i32 = arith.constant 3 : i32
    %146 = arith.index_cast %c3_i32 : i32 to index
    %c0_43 = arith.constant 0 : index
    %c0_44 = arith.constant 0 : index
    %147 = vector.load %arg1[%146, %c0_43, %c0_44] : memref<4x8x48xf32, #tpu.memory_space<vmem>>, vector<1x8x48xf32>
    %148 = vector.shape_cast %147 : vector<1x8x48xf32> to vector<8x48xf32>
    %149 = arith.index_cast %c3_i32 : i32 to index
    %c0_45 = arith.constant 0 : index
    %c0_46 = arith.constant 0 : index
    %150 = vector.load %arg3[%149, %c0_45, %c0_46] : memref<4x8x1xf32, #tpu.memory_space<vmem>>, vector<1x8x1xf32>
    %151 = vector.shape_cast %150 : vector<1x8x1xf32> to vector<8x1xf32>
    %cst_47 = arith.constant dense<0.000000e+00> : vector<8x48xf32>
    %152 = tpu.matmul %141, %3, %cst_47 {dimension_numbers = #tpu.dot_dimension_numbers<[1], [0], [0], [1], [0, 0, 1, 1], [], []>} : vector<8x16xf32>, vector<16x48xf32>, vector<8x48xf32> -> vector<8x48xf32>
    %153 = vector.extract_strided_slice %148 {offsets = [0, 0], sizes = [8, 16], strides = [1, 1]} : vector<8x48xf32> to vector<8x16xf32>
    %154 = vector.extract_strided_slice %152 {offsets = [0, 0], sizes = [8, 16], strides = [1, 1]} : vector<8x48xf32> to vector<8x16xf32>
    %155 = arith.addf %153, %154 : vector<8x16xf32>
    %156 = arith.negf %155 : vector<8x16xf32>
    %157 = math.exp %156 : vector<8x16xf32>
    %cst_48 = arith.constant 1.000000e+00 : f32
    %158 = vector.broadcast %cst_48 : f32 to vector<8x16xf32>
    %159 = arith.addf %158, %157 : vector<8x16xf32>
    %160 = arith.divf %158, %159 : vector<8x16xf32>
    %161 = vector.extract_strided_slice %148 {offsets = [0, 16], sizes = [8, 16], strides = [1, 1]} : vector<8x48xf32> to vector<8x16xf32>
    %162 = vector.extract_strided_slice %152 {offsets = [0, 16], sizes = [8, 16], strides = [1, 1]} : vector<8x48xf32> to vector<8x16xf32>
    %163 = arith.addf %161, %162 : vector<8x16xf32>
    %164 = arith.negf %163 : vector<8x16xf32>
    %165 = math.exp %164 : vector<8x16xf32>
    %cst_49 = arith.constant 1.000000e+00 : f32
    %166 = vector.broadcast %cst_49 : f32 to vector<8x16xf32>
    %167 = arith.addf %166, %165 : vector<8x16xf32>
    %168 = arith.divf %166, %167 : vector<8x16xf32>
    %169 = vector.extract_strided_slice %148 {offsets = [0, 32], sizes = [8, 16], strides = [1, 1]} : vector<8x48xf32> to vector<8x16xf32>
    %170 = vector.extract_strided_slice %152 {offsets = [0, 32], sizes = [8, 16], strides = [1, 1]} : vector<8x48xf32> to vector<8x16xf32>
    %171 = vector.broadcast %4 : vector<1x16xf32> to vector<8x16xf32>
    %172 = arith.addf %170, %171 : vector<8x16xf32>
    %173 = arith.mulf %160, %172 : vector<8x16xf32>
    %174 = arith.addf %169, %173 : vector<8x16xf32>
    %175 = math.tanh %174 : vector<8x16xf32>
    %cst_50 = arith.constant 1.000000e+00 : f32
    %176 = vector.broadcast %cst_50 : f32 to vector<8x16xf32>
    %177 = arith.subf %176, %168 : vector<8x16xf32>
    %178 = arith.mulf %177, %175 : vector<8x16xf32>
    %179 = arith.mulf %168, %141 : vector<8x16xf32>
    %180 = arith.addf %178, %179 : vector<8x16xf32>
    %181 = vector.broadcast %151 : vector<8x1xf32> to vector<8x16xf32>
    %182 = arith.mulf %180, %181 : vector<8x16xf32>
    %cst_51 = arith.constant 1.000000e+00 : f32
    %183 = vector.broadcast %cst_51 : f32 to vector<8x1xf32>
    %184 = arith.subf %183, %151 : vector<8x1xf32>
    %185 = vector.broadcast %184 : vector<8x1xf32> to vector<8x16xf32>
    %186 = arith.mulf %141, %185 : vector<8x16xf32>
    %187 = arith.addf %182, %186 : vector<8x16xf32>
    %188 = arith.index_cast %c3_i32 : i32 to index
    %c0_52 = arith.constant 0 : index
    %c0_53 = arith.constant 0 : index
    %189 = vector.load %arg9[%188, %c0_52, %c0_53] : memref<4x8x16xf32, #tpu.memory_space<vmem>>, vector<1x8x16xf32>
    %190 = vector.shape_cast %189 : vector<1x8x16xf32> to vector<8x16xf32>
    %191 = vector.shape_cast %182 : vector<8x16xf32> to vector<1x8x16xf32>
    tpu.vector_store %arg9[%188, %c0_52, %c0_53], %191 {strides = array<i32>} : memref<4x8x16xf32, #tpu.memory_space<vmem>>, vector<1x8x16xf32>,
    %c4_i32 = arith.constant 4 : i32
    %c0_54 = arith.constant 0 : index
    %c0_55 = arith.constant 0 : index
    %192 = vector.load %arg12[%c0_54, %c0_55] : memref<8x16xf32, #tpu.memory_space<vmem>>, vector<8x16xf32>
    tpu.vector_store %arg12[%c0_54, %c0_55], %187 {strides = array<i32>} : memref<8x16xf32, #tpu.memory_space<vmem>>, vector<8x16xf32>,
    %c0_56 = arith.constant 0 : index
    %c0_57 = arith.constant 0 : index
    %193 = vector.load %arg13[%c0_56, %c0_57] : memref<8x16xf32, #tpu.memory_space<vmem>>, vector<8x16xf32>
    %c0_i32_58 = arith.constant 0 : i32
    %c3_i32_59 = arith.constant 3 : i32
    %194 = arith.subi %c3_i32_59, %c0_i32_58 : i32
    %195 = arith.index_cast %194 : i32 to index
    %c0_60 = arith.constant 0 : index
    %c0_61 = arith.constant 0 : index
    %196 = vector.load %arg2[%195, %c0_60, %c0_61] : memref<4x8x48xf32, #tpu.memory_space<vmem>>, vector<1x8x48xf32>
    %197 = vector.shape_cast %196 : vector<1x8x48xf32> to vector<8x48xf32>
    %198 = arith.index_cast %194 : i32 to index
    %c0_62 = arith.constant 0 : index
    %c0_63 = arith.constant 0 : index
    %199 = vector.load %arg4[%198, %c0_62, %c0_63] : memref<4x8x1xf32, #tpu.memory_space<vmem>>, vector<1x8x1xf32>
    %200 = vector.shape_cast %199 : vector<1x8x1xf32> to vector<8x1xf32>
    %cst_64 = arith.constant dense<0.000000e+00> : vector<8x48xf32>
    %201 = tpu.matmul %193, %5, %cst_64 {dimension_numbers = #tpu.dot_dimension_numbers<[1], [0], [0], [1], [0, 0, 1, 1], [], []>} : vector<8x16xf32>, vector<16x48xf32>, vector<8x48xf32> -> vector<8x48xf32>
    %202 = vector.extract_strided_slice %197 {offsets = [0, 0], sizes = [8, 16], strides = [1, 1]} : vector<8x48xf32> to vector<8x16xf32>
    %203 = vector.extract_strided_slice %201 {offsets = [0, 0], sizes = [8, 16], strides = [1, 1]} : vector<8x48xf32> to vector<8x16xf32>
    %204 = arith.addf %202, %203 : vector<8x16xf32>
    %205 = arith.negf %204 : vector<8x16xf32>
    %206 = math.exp %205 : vector<8x16xf32>
    %cst_65 = arith.constant 1.000000e+00 : f32
    %207 = vector.broadcast %cst_65 : f32 to vector<8x16xf32>
    %208 = arith.addf %207, %206 : vector<8x16xf32>
    %209 = arith.divf %207, %208 : vector<8x16xf32>
    %210 = vector.extract_strided_slice %197 {offsets = [0, 16], sizes = [8, 16], strides = [1, 1]} : vector<8x48xf32> to vector<8x16xf32>
    %211 = vector.extract_strided_slice %201 {offsets = [0, 16], sizes = [8, 16], strides = [1, 1]} : vector<8x48xf32> to vector<8x16xf32>
    %212 = arith.addf %210, %211 : vector<8x16xf32>
    %213 = arith.negf %212 : vector<8x16xf32>
    %214 = math.exp %213 : vector<8x16xf32>
    %cst_66 = arith.constant 1.000000e+00 : f32
    %215 = vector.broadcast %cst_66 : f32 to vector<8x16xf32>
    %216 = arith.addf %215, %214 : vector<8x16xf32>
    %217 = arith.divf %215, %216 : vector<8x16xf32>
    %218 = vector.extract_strided_slice %197 {offsets = [0, 32], sizes = [8, 16], strides = [1, 1]} : vector<8x48xf32> to vector<8x16xf32>
    %219 = vector.extract_strided_slice %201 {offsets = [0, 32], sizes = [8, 16], strides = [1, 1]} : vector<8x48xf32> to vector<8x16xf32>
    %220 = vector.broadcast %6 : vector<1x16xf32> to vector<8x16xf32>
    %221 = arith.addf %219, %220 : vector<8x16xf32>
    %222 = arith.mulf %209, %221 : vector<8x16xf32>
    %223 = arith.addf %218, %222 : vector<8x16xf32>
    %224 = math.tanh %223 : vector<8x16xf32>
    %cst_67 = arith.constant 1.000000e+00 : f32
    %225 = vector.broadcast %cst_67 : f32 to vector<8x16xf32>
    %226 = arith.subf %225, %217 : vector<8x16xf32>
    %227 = arith.mulf %226, %224 : vector<8x16xf32>
    %228 = arith.mulf %217, %193 : vector<8x16xf32>
    %229 = arith.addf %227, %228 : vector<8x16xf32>
    %230 = vector.broadcast %200 : vector<8x1xf32> to vector<8x16xf32>
    %231 = arith.mulf %229, %230 : vector<8x16xf32>
    %cst_68 = arith.constant 1.000000e+00 : f32
    %232 = vector.broadcast %cst_68 : f32 to vector<8x1xf32>
    %233 = arith.subf %232, %200 : vector<8x1xf32>
    %234 = vector.broadcast %233 : vector<8x1xf32> to vector<8x16xf32>
    %235 = arith.mulf %193, %234 : vector<8x16xf32>
    %236 = arith.addf %231, %235 : vector<8x16xf32>
    %237 = arith.index_cast %194 : i32 to index
    %c0_69 = arith.constant 0 : index
    %c0_70 = arith.constant 0 : index
    %238 = vector.load %arg10[%237, %c0_69, %c0_70] : memref<4x8x16xf32, #tpu.memory_space<vmem>>, vector<1x8x16xf32>
    %239 = vector.shape_cast %238 : vector<1x8x16xf32> to vector<8x16xf32>
    %240 = vector.shape_cast %231 : vector<8x16xf32> to vector<1x8x16xf32>
    tpu.vector_store %arg10[%237, %c0_69, %c0_70], %240 {strides = array<i32>} : memref<4x8x16xf32, #tpu.memory_space<vmem>>, vector<1x8x16xf32>,
    %c1_i32_71 = arith.constant 1 : i32
    %c3_i32_72 = arith.constant 3 : i32
    %241 = arith.subi %c3_i32_72, %c1_i32_71 : i32
    %242 = arith.index_cast %241 : i32 to index
    %c0_73 = arith.constant 0 : index
    %c0_74 = arith.constant 0 : index
    %243 = vector.load %arg2[%242, %c0_73, %c0_74] : memref<4x8x48xf32, #tpu.memory_space<vmem>>, vector<1x8x48xf32>
    %244 = vector.shape_cast %243 : vector<1x8x48xf32> to vector<8x48xf32>
    %245 = arith.index_cast %241 : i32 to index
    %c0_75 = arith.constant 0 : index
    %c0_76 = arith.constant 0 : index
    %246 = vector.load %arg4[%245, %c0_75, %c0_76] : memref<4x8x1xf32, #tpu.memory_space<vmem>>, vector<1x8x1xf32>
    %247 = vector.shape_cast %246 : vector<1x8x1xf32> to vector<8x1xf32>
    %cst_77 = arith.constant dense<0.000000e+00> : vector<8x48xf32>
    %248 = tpu.matmul %236, %5, %cst_77 {dimension_numbers = #tpu.dot_dimension_numbers<[1], [0], [0], [1], [0, 0, 1, 1], [], []>} : vector<8x16xf32>, vector<16x48xf32>, vector<8x48xf32> -> vector<8x48xf32>
    %249 = vector.extract_strided_slice %244 {offsets = [0, 0], sizes = [8, 16], strides = [1, 1]} : vector<8x48xf32> to vector<8x16xf32>
    %250 = vector.extract_strided_slice %248 {offsets = [0, 0], sizes = [8, 16], strides = [1, 1]} : vector<8x48xf32> to vector<8x16xf32>
    %251 = arith.addf %249, %250 : vector<8x16xf32>
    %252 = arith.negf %251 : vector<8x16xf32>
    %253 = math.exp %252 : vector<8x16xf32>
    %cst_78 = arith.constant 1.000000e+00 : f32
    %254 = vector.broadcast %cst_78 : f32 to vector<8x16xf32>
    %255 = arith.addf %254, %253 : vector<8x16xf32>
    %256 = arith.divf %254, %255 : vector<8x16xf32>
    %257 = vector.extract_strided_slice %244 {offsets = [0, 16], sizes = [8, 16], strides = [1, 1]} : vector<8x48xf32> to vector<8x16xf32>
    %258 = vector.extract_strided_slice %248 {offsets = [0, 16], sizes = [8, 16], strides = [1, 1]} : vector<8x48xf32> to vector<8x16xf32>
    %259 = arith.addf %257, %258 : vector<8x16xf32>
    %260 = arith.negf %259 : vector<8x16xf32>
    %261 = math.exp %260 : vector<8x16xf32>
    %cst_79 = arith.constant 1.000000e+00 : f32
    %262 = vector.broadcast %cst_79 : f32 to vector<8x16xf32>
    %263 = arith.addf %262, %261 : vector<8x16xf32>
    %264 = arith.divf %262, %263 : vector<8x16xf32>
    %265 = vector.extract_strided_slice %244 {offsets = [0, 32], sizes = [8, 16], strides = [1, 1]} : vector<8x48xf32> to vector<8x16xf32>
    %266 = vector.extract_strided_slice %248 {offsets = [0, 32], sizes = [8, 16], strides = [1, 1]} : vector<8x48xf32> to vector<8x16xf32>
    %267 = vector.broadcast %6 : vector<1x16xf32> to vector<8x16xf32>
    %268 = arith.addf %266, %267 : vector<8x16xf32>
    %269 = arith.mulf %256, %268 : vector<8x16xf32>
    %270 = arith.addf %265, %269 : vector<8x16xf32>
    %271 = math.tanh %270 : vector<8x16xf32>
    %cst_80 = arith.constant 1.000000e+00 : f32
    %272 = vector.broadcast %cst_80 : f32 to vector<8x16xf32>
    %273 = arith.subf %272, %264 : vector<8x16xf32>
    %274 = arith.mulf %273, %271 : vector<8x16xf32>
    %275 = arith.mulf %264, %236 : vector<8x16xf32>
    %276 = arith.addf %274, %275 : vector<8x16xf32>
    %277 = vector.broadcast %247 : vector<8x1xf32> to vector<8x16xf32>
    %278 = arith.mulf %276, %277 : vector<8x16xf32>
    %cst_81 = arith.constant 1.000000e+00 : f32
    %279 = vector.broadcast %cst_81 : f32 to vector<8x1xf32>
    %280 = arith.subf %279, %247 : vector<8x1xf32>
    %281 = vector.broadcast %280 : vector<8x1xf32> to vector<8x16xf32>
    %282 = arith.mulf %236, %281 : vector<8x16xf32>
    %283 = arith.addf %278, %282 : vector<8x16xf32>
    %284 = arith.index_cast %241 : i32 to index
    %c0_82 = arith.constant 0 : index
    %c0_83 = arith.constant 0 : index
    %285 = vector.load %arg10[%284, %c0_82, %c0_83] : memref<4x8x16xf32, #tpu.memory_space<vmem>>, vector<1x8x16xf32>
    %286 = vector.shape_cast %285 : vector<1x8x16xf32> to vector<8x16xf32>
    %287 = vector.shape_cast %278 : vector<8x16xf32> to vector<1x8x16xf32>
    tpu.vector_store %arg10[%284, %c0_82, %c0_83], %287 {strides = array<i32>} : memref<4x8x16xf32, #tpu.memory_space<vmem>>, vector<1x8x16xf32>,
    %c2_i32_84 = arith.constant 2 : i32
    %c3_i32_85 = arith.constant 3 : i32
    %288 = arith.subi %c3_i32_85, %c2_i32_84 : i32
    %289 = arith.index_cast %288 : i32 to index
    %c0_86 = arith.constant 0 : index
    %c0_87 = arith.constant 0 : index
    %290 = vector.load %arg2[%289, %c0_86, %c0_87] : memref<4x8x48xf32, #tpu.memory_space<vmem>>, vector<1x8x48xf32>
    %291 = vector.shape_cast %290 : vector<1x8x48xf32> to vector<8x48xf32>
    %292 = arith.index_cast %288 : i32 to index
    %c0_88 = arith.constant 0 : index
    %c0_89 = arith.constant 0 : index
    %293 = vector.load %arg4[%292, %c0_88, %c0_89] : memref<4x8x1xf32, #tpu.memory_space<vmem>>, vector<1x8x1xf32>
    %294 = vector.shape_cast %293 : vector<1x8x1xf32> to vector<8x1xf32>
    %cst_90 = arith.constant dense<0.000000e+00> : vector<8x48xf32>
    %295 = tpu.matmul %283, %5, %cst_90 {dimension_numbers = #tpu.dot_dimension_numbers<[1], [0], [0], [1], [0, 0, 1, 1], [], []>} : vector<8x16xf32>, vector<16x48xf32>, vector<8x48xf32> -> vector<8x48xf32>
    %296 = vector.extract_strided_slice %291 {offsets = [0, 0], sizes = [8, 16], strides = [1, 1]} : vector<8x48xf32> to vector<8x16xf32>
    %297 = vector.extract_strided_slice %295 {offsets = [0, 0], sizes = [8, 16], strides = [1, 1]} : vector<8x48xf32> to vector<8x16xf32>
    %298 = arith.addf %296, %297 : vector<8x16xf32>
    %299 = arith.negf %298 : vector<8x16xf32>
    %300 = math.exp %299 : vector<8x16xf32>
    %cst_91 = arith.constant 1.000000e+00 : f32
    %301 = vector.broadcast %cst_91 : f32 to vector<8x16xf32>
    %302 = arith.addf %301, %300 : vector<8x16xf32>
    %303 = arith.divf %301, %302 : vector<8x16xf32>
    %304 = vector.extract_strided_slice %291 {offsets = [0, 16], sizes = [8, 16], strides = [1, 1]} : vector<8x48xf32> to vector<8x16xf32>
    %305 = vector.extract_strided_slice %295 {offsets = [0, 16], sizes = [8, 16], strides = [1, 1]} : vector<8x48xf32> to vector<8x16xf32>
    %306 = arith.addf %304, %305 : vector<8x16xf32>
    %307 = arith.negf %306 : vector<8x16xf32>
    %308 = math.exp %307 : vector<8x16xf32>
    %cst_92 = arith.constant 1.000000e+00 : f32
    %309 = vector.broadcast %cst_92 : f32 to vector<8x16xf32>
    %310 = arith.addf %309, %308 : vector<8x16xf32>
    %311 = arith.divf %309, %310 : vector<8x16xf32>
    %312 = vector.extract_strided_slice %291 {offsets = [0, 32], sizes = [8, 16], strides = [1, 1]} : vector<8x48xf32> to vector<8x16xf32>
    %313 = vector.extract_strided_slice %295 {offsets = [0, 32], sizes = [8, 16], strides = [1, 1]} : vector<8x48xf32> to vector<8x16xf32>
    %314 = vector.broadcast %6 : vector<1x16xf32> to vector<8x16xf32>
    %315 = arith.addf %313, %314 : vector<8x16xf32>
    %316 = arith.mulf %303, %315 : vector<8x16xf32>
    %317 = arith.addf %312, %316 : vector<8x16xf32>
    %318 = math.tanh %317 : vector<8x16xf32>
    %cst_93 = arith.constant 1.000000e+00 : f32
    %319 = vector.broadcast %cst_93 : f32 to vector<8x16xf32>
    %320 = arith.subf %319, %311 : vector<8x16xf32>
    %321 = arith.mulf %320, %318 : vector<8x16xf32>
    %322 = arith.mulf %311, %283 : vector<8x16xf32>
    %323 = arith.addf %321, %322 : vector<8x16xf32>
    %324 = vector.broadcast %294 : vector<8x1xf32> to vector<8x16xf32>
    %325 = arith.mulf %323, %324 : vector<8x16xf32>
    %cst_94 = arith.constant 1.000000e+00 : f32
    %326 = vector.broadcast %cst_94 : f32 to vector<8x1xf32>
    %327 = arith.subf %326, %294 : vector<8x1xf32>
    %328 = vector.broadcast %327 : vector<8x1xf32> to vector<8x16xf32>
    %329 = arith.mulf %283, %328 : vector<8x16xf32>
    %330 = arith.addf %325, %329 : vector<8x16xf32>
    %331 = arith.index_cast %288 : i32 to index
    %c0_95 = arith.constant 0 : index
    %c0_96 = arith.constant 0 : index
    %332 = vector.load %arg10[%331, %c0_95, %c0_96] : memref<4x8x16xf32, #tpu.memory_space<vmem>>, vector<1x8x16xf32>
    %333 = vector.shape_cast %332 : vector<1x8x16xf32> to vector<8x16xf32>
    %334 = vector.shape_cast %325 : vector<8x16xf32> to vector<1x8x16xf32>
    tpu.vector_store %arg10[%331, %c0_95, %c0_96], %334 {strides = array<i32>} : memref<4x8x16xf32, #tpu.memory_space<vmem>>, vector<1x8x16xf32>,
    %c3_i32_97 = arith.constant 3 : i32
    %c3_i32_98 = arith.constant 3 : i32
    %335 = arith.subi %c3_i32_98, %c3_i32_97 : i32
    %336 = arith.index_cast %335 : i32 to index
    %c0_99 = arith.constant 0 : index
    %c0_100 = arith.constant 0 : index
    %337 = vector.load %arg2[%336, %c0_99, %c0_100] : memref<4x8x48xf32, #tpu.memory_space<vmem>>, vector<1x8x48xf32>
    %338 = vector.shape_cast %337 : vector<1x8x48xf32> to vector<8x48xf32>
    %339 = arith.index_cast %335 : i32 to index
    %c0_101 = arith.constant 0 : index
    %c0_102 = arith.constant 0 : index
    %340 = vector.load %arg4[%339, %c0_101, %c0_102] : memref<4x8x1xf32, #tpu.memory_space<vmem>>, vector<1x8x1xf32>
    %341 = vector.shape_cast %340 : vector<1x8x1xf32> to vector<8x1xf32>
    %cst_103 = arith.constant dense<0.000000e+00> : vector<8x48xf32>
    %342 = tpu.matmul %330, %5, %cst_103 {dimension_numbers = #tpu.dot_dimension_numbers<[1], [0], [0], [1], [0, 0, 1, 1], [], []>} : vector<8x16xf32>, vector<16x48xf32>, vector<8x48xf32> -> vector<8x48xf32>
    %343 = vector.extract_strided_slice %338 {offsets = [0, 0], sizes = [8, 16], strides = [1, 1]} : vector<8x48xf32> to vector<8x16xf32>
    %344 = vector.extract_strided_slice %342 {offsets = [0, 0], sizes = [8, 16], strides = [1, 1]} : vector<8x48xf32> to vector<8x16xf32>
    %345 = arith.addf %343, %344 : vector<8x16xf32>
    %346 = arith.negf %345 : vector<8x16xf32>
    %347 = math.exp %346 : vector<8x16xf32>
    %cst_104 = arith.constant 1.000000e+00 : f32
    %348 = vector.broadcast %cst_104 : f32 to vector<8x16xf32>
    %349 = arith.addf %348, %347 : vector<8x16xf32>
    %350 = arith.divf %348, %349 : vector<8x16xf32>
    %351 = vector.extract_strided_slice %338 {offsets = [0, 16], sizes = [8, 16], strides = [1, 1]} : vector<8x48xf32> to vector<8x16xf32>
    %352 = vector.extract_strided_slice %342 {offsets = [0, 16], sizes = [8, 16], strides = [1, 1]} : vector<8x48xf32> to vector<8x16xf32>
    %353 = arith.addf %351, %352 : vector<8x16xf32>
    %354 = arith.negf %353 : vector<8x16xf32>
    %355 = math.exp %354 : vector<8x16xf32>
    %cst_105 = arith.constant 1.000000e+00 : f32
    %356 = vector.broadcast %cst_105 : f32 to vector<8x16xf32>
    %357 = arith.addf %356, %355 : vector<8x16xf32>
    %358 = arith.divf %356, %357 : vector<8x16xf32>
    %359 = vector.extract_strided_slice %338 {offsets = [0, 32], sizes = [8, 16], strides = [1, 1]} : vector<8x48xf32> to vector<8x16xf32>
    %360 = vector.extract_strided_slice %342 {offsets = [0, 32], sizes = [8, 16], strides = [1, 1]} : vector<8x48xf32> to vector<8x16xf32>
    %361 = vector.broadcast %6 : vector<1x16xf32> to vector<8x16xf32>
    %362 = arith.addf %360, %361 : vector<8x16xf32>
    %363 = arith.mulf %350, %362 : vector<8x16xf32>
    %364 = arith.addf %359, %363 : vector<8x16xf32>
    %365 = math.tanh %364 : vector<8x16xf32>
    %cst_106 = arith.constant 1.000000e+00 : f32
    %366 = vector.broadcast %cst_106 : f32 to vector<8x16xf32>
    %367 = arith.subf %366, %358 : vector<8x16xf32>
    %368 = arith.mulf %367, %365 : vector<8x16xf32>
    %369 = arith.mulf %358, %330 : vector<8x16xf32>
    %370 = arith.addf %368, %369 : vector<8x16xf32>
    %371 = vector.broadcast %341 : vector<8x1xf32> to vector<8x16xf32>
    %372 = arith.mulf %370, %371 : vector<8x16xf32>
    %cst_107 = arith.constant 1.000000e+00 : f32
    %373 = vector.broadcast %cst_107 : f32 to vector<8x1xf32>
    %374 = arith.subf %373, %341 : vector<8x1xf32>
    %375 = vector.broadcast %374 : vector<8x1xf32> to vector<8x16xf32>
    %376 = arith.mulf %330, %375 : vector<8x16xf32>
    %377 = arith.addf %372, %376 : vector<8x16xf32>
    %378 = arith.index_cast %335 : i32 to index
    %c0_108 = arith.constant 0 : index
    %c0_109 = arith.constant 0 : index
    %379 = vector.load %arg10[%378, %c0_108, %c0_109] : memref<4x8x16xf32, #tpu.memory_space<vmem>>, vector<1x8x16xf32>
    %380 = vector.shape_cast %379 : vector<1x8x16xf32> to vector<8x16xf32>
    %381 = vector.shape_cast %372 : vector<8x16xf32> to vector<1x8x16xf32>
    tpu.vector_store %arg10[%378, %c0_108, %c0_109], %381 {strides = array<i32>} : memref<4x8x16xf32, #tpu.memory_space<vmem>>, vector<1x8x16xf32>,
    %c4_i32_110 = arith.constant 4 : i32
    %c0_111 = arith.constant 0 : index
    %c0_112 = arith.constant 0 : index
    %382 = vector.load %arg13[%c0_111, %c0_112] : memref<8x16xf32, #tpu.memory_space<vmem>>, vector<8x16xf32>
    tpu.vector_store %arg13[%c0_111, %c0_112], %377 {strides = array<i32>} : memref<8x16xf32, #tpu.memory_space<vmem>>, vector<8x16xf32>,
    %c1_i32_113 = arith.constant 1 : i32
    %383 = arith.cmpi eq, %arg0, %c1_i32_113 : i32
    %384 = arith.extui %383 : i1 to i32
    %c0_i32_114 = arith.constant 0 : i32
    %385 = arith.cmpi ne, %384, %c0_i32_114 : i32
    scf.if %385 {
      %c0_115 = arith.constant 0 : index
      %c0_116 = arith.constant 0 : index
      %386 = vector.load %arg12[%c0_115, %c0_116] : memref<8x16xf32, #tpu.memory_space<vmem>>, vector<8x16xf32>
      %c0_117 = arith.constant 0 : index
      %c0_118 = arith.constant 0 : index
      %c0_119 = arith.constant 0 : index
      %387 = vector.load %arg11[%c0_117, %c0_118, %c0_119] : memref<2x8x16xf32, #tpu.memory_space<vmem>>, vector<1x8x16xf32>
      %388 = vector.shape_cast %387 : vector<1x8x16xf32> to vector<8x16xf32>
      %389 = vector.shape_cast %386 : vector<8x16xf32> to vector<1x8x16xf32>
      tpu.vector_store %arg11[%c0_117, %c0_118, %c0_119], %389 {strides = array<i32>} : memref<2x8x16xf32, #tpu.memory_space<vmem>>, vector<1x8x16xf32>,
      %c0_120 = arith.constant 0 : index
      %c0_121 = arith.constant 0 : index
      %390 = vector.load %arg13[%c0_120, %c0_121] : memref<8x16xf32, #tpu.memory_space<vmem>>, vector<8x16xf32>
      %c1 = arith.constant 1 : index
      %c0_122 = arith.constant 0 : index
      %c0_123 = arith.constant 0 : index
      %391 = vector.load %arg11[%c1, %c0_122, %c0_123] : memref<2x8x16xf32, #tpu.memory_space<vmem>>, vector<1x8x16xf32>
      %392 = vector.shape_cast %391 : vector<1x8x16xf32> to vector<8x16xf32>
      %393 = vector.shape_cast %390 : vector<8x16xf32> to vector<1x8x16xf32>
      tpu.vector_store %arg11[%c1, %c0_122, %c0_123], %393 {strides = array<i32>} : memref<2x8x16xf32, #tpu.memory_space<vmem>>, vector<1x8x16xf32>,
    } else {
    }
    return
  }
  func.func @transform_0(%arg0: i32) -> (i32, i32, i32) {
    %c0_i32 = arith.constant 0 : i32
    %c0_i32_0 = arith.constant 0 : i32
    %c0_i32_1 = arith.constant 0 : i32
    return %arg0, %c0_i32, %c0_i32_0 : i32, i32, i32
  }
  func.func @transform_1(%arg0: i32) -> (i32, i32, i32) {
    %c1_i32 = arith.constant 1 : i32
    %0 = arith.subi %c1_i32, %arg0 : i32
    %c0_i32 = arith.constant 0 : i32
    %c0_i32_0 = arith.constant 0 : i32
    %c0_i32_1 = arith.constant 0 : i32
    return %0, %c0_i32, %c0_i32_0 : i32, i32, i32
  }
  func.func @transform_2(%arg0: i32) -> (i32, i32, i32) {
    %c0_i32 = arith.constant 0 : i32
    %c0_i32_0 = arith.constant 0 : i32
    %c0_i32_1 = arith.constant 0 : i32
    return %arg0, %c0_i32, %c0_i32_0 : i32, i32, i32
  }
  func.func @transform_3(%arg0: i32) -> (i32, i32, i32) {
    %c1_i32 = arith.constant 1 : i32
    %0 = arith.subi %c1_i32, %arg0 : i32
    %c0_i32 = arith.constant 0 : i32
    %c0_i32_0 = arith.constant 0 : i32
    %c0_i32_1 = arith.constant 0 : i32
    return %0, %c0_i32, %c0_i32_0 : i32, i32, i32
  }
  func.func @transform_4(%arg0: i32) -> (i32, i32) {
    %c0_i32 = arith.constant 0 : i32
    %c0_i32_0 = arith.constant 0 : i32
    %c0_i32_1 = arith.constant 0 : i32
    return %c0_i32, %c0_i32_0 : i32, i32
  }
  func.func @transform_5(%arg0: i32) -> (i32, i32) {
    %c0_i32 = arith.constant 0 : i32
    %c0_i32_0 = arith.constant 0 : i32
    %c0_i32_1 = arith.constant 0 : i32
    return %c0_i32, %c0_i32_0 : i32, i32
  }
  func.func @transform_6(%arg0: i32) -> (i32, i32) {
    %c0_i32 = arith.constant 0 : i32
    %c0_i32_0 = arith.constant 0 : i32
    %c0_i32_1 = arith.constant 0 : i32
    return %c0_i32, %c0_i32_0 : i32, i32
  }
  func.func @transform_7(%arg0: i32) -> (i32, i32) {
    %c0_i32 = arith.constant 0 : i32
    %c0_i32_0 = arith.constant 0 : i32
    %c0_i32_1 = arith.constant 0 : i32
    return %c0_i32, %c0_i32_0 : i32, i32
  }
  func.func @transform_8(%arg0: i32) -> (i32, i32, i32) {
    %c0_i32 = arith.constant 0 : i32
    %c0_i32_0 = arith.constant 0 : i32
    %c0_i32_1 = arith.constant 0 : i32
    return %arg0, %c0_i32, %c0_i32_0 : i32, i32, i32
  }
  func.func @transform_9(%arg0: i32) -> (i32, i32, i32) {
    %c1_i32 = arith.constant 1 : i32
    %0 = arith.subi %c1_i32, %arg0 : i32
    %c0_i32 = arith.constant 0 : i32
    %c0_i32_0 = arith.constant 0 : i32
    %c0_i32_1 = arith.constant 0 : i32
    return %0, %c0_i32, %c0_i32_0 : i32, i32, i32
  }
  func.func @transform_10(%arg0: i32) -> (i32, i32, i32) {
    %c0_i32 = arith.constant 0 : i32
    %c0_i32_0 = arith.constant 0 : i32
    %c0_i32_1 = arith.constant 0 : i32
    %c0_i32_2 = arith.constant 0 : i32
    return %c0_i32, %c0_i32_0, %c0_i32_1 : i32, i32, i32
  }
}

</mosaic_0001>

<bundles_post_ra>
// kernel: tpu_custom_call.1
= control target key start
LH: loop header
LB: loop body
LE: loop exit
PB: predicated region body
PF: predicated region fallthrough
CT: control target
= control target key end

     0   :  { %s2683_s0 = inlined_call_operand.vmem [shape: f32[8,8,48], index: 0, kind: input, shape index: {}]   ;;  %s2684_s1 = inlined_call_operand.vmem [shape: f32[8,8,48], index: 1, kind: input, shape index: {}]   ;;  %s2685_s2 = inlined_call_operand.vmem [shape: f32[8,8,1], index: 2, kind: input, shape index: {}]   ;;  %s2686_s3 = inlined_call_operand.vmem [shape: f32[8,8,1], index: 3, kind: input, shape index: {}]   ;;  %s2687_s4 = inlined_call_operand.vmem [shape: f32[16,48], index: 4, kind: input, shape index: {}]   ;;  %s2688_s5 = inlined_call_operand.vmem [shape: f32[1,16], index: 5, kind: input, shape index: {}]   ;;  %s2689_s6 = inlined_call_operand.vmem [shape: f32[16,48], index: 6, kind: input, shape index: {}]   ;;  %s2690_s7 = inlined_call_operand.vmem [shape: f32[1,16], index: 7, kind: input, shape index: {}]   ;;  %s2691_s8 = inlined_call_operand.hbm [shape: f32[8,8,16], index: 8, kind: output, shape index: {0}]   ;;  %s2692_s9 = inlined_call_operand.hbm [shape: f32[8,8,16], index: 9, kind: output, shape index: {1}]   ;;  %s2693_s10 = inlined_call_operand.hbm [shape: f32[2,8,16], index: 10, kind: output, shape index: {2}]  }
   0x1   :  { %2709 = sst [smem:[#allocation22_spill]] %s2691_s8 }
   0x2   :  { %2710 = sst [smem:[#allocation23_spill]] %s2693_s10 }
   0x3   :  { %16 = vsyncpa [#allocation5], 0 }
   0x4   :  { %18 = vsyncpa [#allocation5 + $0x1], 0 }
   0x5   :  { %19 = vsyncpa [#allocation7], 0 }
   0x6   :  { %21 = vsyncpa [#allocation7 + $0x1], 0  ;;  %s2228_s13 = smov 0   ;;  %s2230_s14 = smov 0  }
   0x7   :  { %s2232_s15 = smov 0   ;;  %s2234_s16 = smov 0  }
   0x8   :  { %s2236_s17 = smov 0   ;;  %s2238_s18 = smov 0  }
   0x9   :  { %s2240_s19 = smov 0  }
   0xa LB: > { %2711 = sst [smem:[#allocation12_spill]] %s2137_s14  ;;  %s2264_s20 = sadd.s32 4294967295, %s2157_s19   ;;  %s2157_s19 = sphi %s2240_s19, %s2735_s19   ;;  %s2153_s18 = sphi %s2238_s18, %s2740_s18   ;;  %s2149_s17 = sphi %s2236_s17, %s2742_s17   ;;  %s2145_s16 = sphi %s2234_s16, %s2741_s16   ;;  %s2141_s15 = sphi %s2232_s15, %s2738_s15   ;;  %s2137_s14 = sphi %s2230_s14, %s2737_s14   ;;  %s2133_s13 = sphi %s2228_s13, %s2736_s13  }
   0xb   : > { %2712 = sst [smem:[#allocation13_spill]] %s2141_s15  ;;  %s2694_s21 = sadd.s32 4294967294, %s2157_s19  }
   0xc   : > { %2713 = sst [smem:[#allocation14_spill]] %s2145_s16  ;;  %s2268_s22 = sadd.s32 1, %s2157_s19  }
   0xd   : > { %2714 = sst [smem:[#allocation15_spill]] %s2153_s18  ;;  %s226_s23 = sadd.s32 1, %s2153_s18 }
   0xe   : > { %2715 = sst [smem:[#allocation16_spill]] %s2157_s19  ;;  %s223_s24 = ssub.s32 %s2157_s19, %s2268_s22 }
   0xf   : > { %2716 = sst [smem:[#allocation17_spill]] %s2268_s22  ;;  %p236_p0 = scmp.ne.s32.totalorder %s2153_s18, %s2149_s17 }
  0x10   : > { %p224_p1 = scmp.eq.s32.totalorder %s223_s24, 0  ;;  %p237_p2 = scmp.eq.s32.totalorder %s2264_s20, 1 }
  0x11   : > { %p242_p3 = scmp.ne.s32.totalorder %s2149_s17, %s2145_s16  ;;  %p2280_p4 = scmp.eq.s32.totalorder %s2694_s21, 1 }
  0x12   : > { %s2285_s26 = scalar_select %p224_p1, %s2153_s18, %s226_s23  }
  0x13   : > { %p2289_p5 = por %p237_p2, %p236_p0  ;;  %p2295_p6 = por %p2280_p4, %p242_p3 }
  0x14   : > { %2718 = sst [smem:[#allocation18_spill]] %s2285_s26  ;;  %s249_s29 = ssub.s32 1, %s2157_s19 }
  0x15   : > { %s2720_s28 = scalar_select %p2295_p6, 1, 0 }
  0x16   : > { %s250_s30 = ssub.s32 1, %s2268_s22  ;;  %s254_s12 = sadd.s32 1, %s2141_s15 }
  0x17   : > { %2721 = sst [smem:[#allocation19_spill]] %s2720_s28  ;;  %s251_s11 = ssub.s32 %s249_s29, %s250_s30 }
  0x18   : > { %p252_p7 = scmp.eq.s32.totalorder %s251_s11, 0  ;;  %p264_p8 = scmp.ne.s32.totalorder %s2141_s15, %s2137_s14 }
  0x19   : > { %p270_p9 = scmp.ne.s32.totalorder %s2137_s14, %s2133_s13  ;;  %p1708_p10 = scmp.ge.s32.totalorder %s2157_s19, 1 }
  0x1a   : > { %s2308_s23 = scalar_select %p252_p7, %s2141_s15, %s254_s12  }
  0x1b   : > { %p2312_p11 = por %p264_p8, %p237_p2  ;;  %p2318_p12 = por %p270_p9, %p2280_p4 }
  0x1c   : > { %2722 = sst [smem:[#allocation20_spill]] %s2308_s23  ;;  %p362_p13 = scmp.lt.s32.totalorder %s2157_s19, 3 }
  0x1d   : > { %s2724_s21 = scalar_select %p2318_p12, 1, 0 }
  0x1e   : > { %p363_p0 = pnand %p1708_p10, %p362_p13 }
  0x1f   : > { %2725 = sst [smem:[#allocation21_spill]] %s2724_s21  ;;  %s2702_s13 = sand.u32 (!%p363_p0), 1, %s2149_s17  }
  0x20   : > { %366 = sbr.rel (%p363_p0) target bundleno = 4338 (0x10f2), region = 52  ;;  %s417_s29 = sand.u32 (!%p363_p0), 1, %s2137_s14  }
  0x21   : > { %s1709_s30 = sshll.u32 (!%p363_p0), %s2702_s13, 5  ;;  %s1710_s11 = sshll.u32 (!%p363_p0), %s417_s29, 5 }
  0x22   : > { %s1711_s12 = sshll.u32 (!%p363_p0), %s2264_s20, 2  ;;  %s2706_s25 = ssub.s32 (!%p363_p0), 1, %s2264_s20 }
  0x23   : > { %p423_p1 = scmp.lt.s32.totalorder (!%p363_p0), %s1711_s12, 7  ;;  %s1713_s26 = sshll.u32 (!%p363_p0), %s2706_s25, 2 }
  0x24   : > { %p430_p3 = scmp.lt.s32.totalorder (!%p363_p0), %s1713_s26, 7  ;;  %s2351_s8 = scalar_lea.vmem (!%p363_p0), [#allocation4], %s1709_s30 }
  0x25   : > { %s2353_s15 = scalar_lea.vmem (!%p363_p0), [#allocation6], %s1710_s11  ;;  %p1719_p4 = scmp.ne.s32.totalorder (!%p363_p0), %s2264_s20, 0 }
  0x27   : > { %s2744_s12 = smov (!%p423_p1, %s1711_s12), 7  ;;  %s2746_s26 = smov (!%p430_p3, %s1713_s26), 7 }
  0x28   : > { %s1712_s18 = sshll.u32 %s2744_s12, 3  ;;  %s1714_s21 = sshll.u32 %s2746_s26, 3  ;;  %vm457_vm0 = vcmask (!%p1719_p4), 130048   ;;  %v2159_v0 = vmov (!%p1719_p4), 0.0  }
  0x29   : > { %s2334_s22 = scalar_lea.vmem %s2683_s0, %s1712_s18  ;;  %s2339_s13 = scalar_lea.vmem %s2684_s1, %s1714_s21  ;;  %458 = vst.msk [vmem:[#allocation2] sm:$0xff] (!%p1719_p4), %vm457_vm0, %v2159_v0  ;;  %459 = vst.msk [vmem:[#allocation3] sm:$0xff] (!%p1719_p4), %vm457_vm0, %v2159_v0 }
  0x2a   : > { %s2344_s19 = scalar_lea.vmem %s2685_s2, %s1712_s18  ;;  %s2349_s12 = scalar_lea.vmem %s2686_s3, %s1714_s21 }
  0x2b   : > { %456 = sbr.rel (%p1719_p4) target bundleno = 50 (0x32), region = 56 }
  0x32 PF: > { %v460_v1 = vld [vmem:[%s2687_s4] sm:$0xff]  ;;  %v461_v2 = vld [vmem:[%s2687_s4 + $0x8] sm:$0xff]  ;;  %v2160_v3 = vmov 0.0|0.0   ;;  %vm2161_vm1 = vmmov 0   ;;  %v2162_v5 = vmov 0.0   ;;  %s2163_s28 = smov 32  }
  0x33   : > { %1849 = vmatprep.subr.bf16.mxu0 %v2160_v3  ;;  %v2363_v4 = vpack.c.bf16 %v461_v2, %v460_v1  ;;  %1797 = vmatprep.mubr.msk.f32.mxu0 %vm2161_vm1, %v2162_v5  ;;  %v1722_v6 = vld [vmem:[%s2688_s5] ss:$0 sm:$0xff]  ;;  %vm469_vm2 = vcmask 130048   ;;  %v2164_v8 = vmov 0   ;;  %s2165_s23 = smov 96   ;;  %s2166_s30 = smov 112  }
  0x34   : > { %555 = vrot.lane.b32.xlu0 %v1722_v6, %s2163_s28  ;;  %1852 = vmatprep.subr.bf16.mxu1 %v2160_v3  ;;  %v466_v7 = vld [vmem:[#allocation2] sm:$0xff]  ;;  %s2167_s11 = smov 16   ;;  %v1724_v42 = vld [vmem:[%s2344_s19 + $0x8] sm:$0xff]  ;;  %p1756_p7 = scmp.ne.s32.totalorder %s2264_s20, 1 }
  0x35   : > { %1851 = vmatpush3.bf16.msra.mxu0 %v2363_v4  ;;  %1854 = vmatpush3.bf16.msra.mxu1 %v2363_v4  ;;  %v468_v13 = vld [vmem:[%s2344_s19] sm:$0xff]  ;;  %v1723_v43 = vld [vmem:[%s2334_s22 + $0x8] sm:$0xff]  ;;  %v716_v51 = vsub.f32 1.0, %v1724_v42 }
  0x36   : > { %1804 = vmatprep.mubr.msk.f32.mxu1 %vm2161_vm1, %v2162_v5  ;;  %1855 = vmatprep.subr.bf16.mxu0 %v2160_v3  ;;  %v467_v14 = vld [vmem:[%s2334_s22] sm:$0xff]  ;;  %v587_v22 = vsub.f32 1.0, %v468_v13 }
  0x37   : > { %1858 = vmatprep.subr.bf16.mxu1 %v2160_v3  ;;  %1959 = vset.pattern.permute.xlu1 %v2164_v8  ;;  %v1742_v58 = vld [vmem:[%s2690_s7] ss:$0 sm:$0xff] }
  0x38   : > { %1798 = vmatmul.mubr.msk.f32.vlgmr.msra.gmra.mrb[0].mxu0 %vm469_vm2, %v466_v7  ;;  %1960 = vset.pattern.permute.xlu0 %v2164_v8  ;;  %v463_v2 = vld [vmem:[%s2689_s6] sm:$0xff]  ;;  %v987_v8 = vld [vmem:[#allocation3] sm:$0xff] }
  0x39   : > { %1857 = vmatpush3.bf16.msra.mxu0 %v2363_v4  ;;  %1811 = vmatprep.mubr.msk.f32.mxu0 %vm2161_vm1, %v2162_v5 }
  0x3a   : > { %1861 = vmatprep.subr.bf16.mxu0 %v2160_v3 }
  0xa6   : > { %v2383_v9 = vpop.permute.xlu0 %555 }
 0x10b   : > { %v539_v10 = vpop.f32.mrb[0].mxu0 }
 0x10c   : > { %v558_v11 = vadd.f32 %v2383_v9, %v539_v10  ;;  %v1799_v12 = vpop.f32.mrb[1].mxu0  ;;  %v543_v15 = vadd.f32 %v539_v10, %v467_v14 }
 0x10e   : > { %560 = vrot.lane.b32.xlu0 %v558_v11, %s2165_s23  ;;  %v1721_v16 = vmul.f32 -1.442695, %v543_v15 }
 0x110   : > { %1961 = vpow2.f32 %v1721_v16 }
 0x112   : > { %583 = vperm.xlu0 %1960, %v468_v13  }
 0x11a   : > { %v1962_v17 = vpop.eup %1961 }
 0x11b   : > { %v547_v18 = vadd.f32 1.0, %v1962_v17  ;;  %v1728_v17 = vld [vmem:[%s2334_s22 + $0x10] sm:$0xff] }
 0x11d   : > { %1963 = vrcp.f32 %v547_v18 }
 0x127   : > { %v1964_v19 = vpop.eup %1963 }
 0x128   : > { %v570_v30 = vsub.f32 1.0, %v1964_v19 }
 0x180   : > { %v561_v20 = vpop.permute.xlu0 %560 }
 0x181   : > { %v563_v21 = vmul.f32 %v1964_v19, %v561_v20 }
 0x183   : > { %565 = vrot.lane.b32.xlu1 %v563_v21, %s2163_s28 }
 0x187   : > { %590 = vperm.xlu1 %1959, %v587_v22  }
 0x191   : > { %v584_v29 = vpop.permute.xlu0 %583 }
 0x1f5   : > { %v566_v23 = vpop.permute.xlu1 %565 }
 0x1f6   : > { %v568_v24 = vadd.f32 %v566_v23, %v467_v14 }
 0x1f8   : > { %1965 = vtanh.f32 %v568_v24 }
 0x202   : > { %v1966_v25 = vpop.eup %1965 }
 0x203   : > { %572 = vrot.lane.b32.xlu1 %v1966_v25, %s2166_s30 }
 0x206   : > { %v591_v26 = vpop.permute.xlu1 %590 }
 0x207   : > { %576 = vrot.lane.b32.xlu1 %v466_v7, %s2167_s11  ;;  %v593_v27 = vmul.f32 %v591_v26, %v466_v7 }
 0x209   : > { %595 = vrot.lane.b32.xlu0 %v593_v27, %s2167_s11 }
 0x275   : > { %v573_v28 = vpop.permute.xlu1 %572 }
 0x276   : > { %v575_v32 = vmul.f32 %v573_v28, %v570_v30 }
 0x279   : > { %v577_v31 = vpop.permute.xlu1 %576 }
 0x27a   : > { %v579_v33 = vmul.f32 %v1964_v19, %v577_v31  ;;  %v1738_v19 = vld [vmem:[%s2339_s13 + $0x18] sm:$0xff] }
 0x27b   : > { %v596_v35 = vpop.permute.xlu0 %595 }
 0x27c   : > { %v580_v34 = vadd.f32 %v579_v33, %v575_v32 }
 0x27e   : > { %v2393_v36 = vmul.f32 %v584_v29, %v580_v34  ;;  %v1739_v29 = vld [vmem:[%s2349_s12 + $0x18] sm:$0xff]  ;;  %v1729_v34 = vld [vmem:[%s2344_s19 + $0x10] sm:$0xff] }
 0x27f   : > { %v1109_v31 = vsub.f32 1.0, %v1739_v29 }
 0x280   : > { %v598_v37 = vadd.f32 %v596_v35, %v2393_v36 }
 0x282   : > { %609 = vrot.lane.b32.xlu1 %v598_v37, %s2166_s30 }
 0x2f4   : > { %v610_v38 = vpop.permute.xlu1 %609 }
 0x2f5   : > { %1805 = vmatmul.mubr.msk.f32.vlgmr.msra.gmra.mrb[0].mxu1 %vm469_vm2, %v610_v38 }
 0x2f6   : > { %1860 = vmatpush3.bf16.msra.mxu1 %v2363_v4  ;;  %1818 = vmatprep.mubr.msk.f32.mxu1 %vm2161_vm1, %v2162_v5  ;;  %v464_v4 = vld [vmem:[%s2689_s6 + $0x8] sm:$0xff] }
 0x2f7   : > { %1864 = vmatprep.subr.bf16.mxu1 %v2160_v3  ;;  %v2425_v6 = vpack.c.bf16 %v464_v4, %v463_v2 }
 0x3c8   : > { %v679_v39 = vpop.f32.mrb[0].mxu1 }
 0x3c9   : > { %v690_v40 = vadd.f32 %v679_v39, %v2383_v9  ;;  %v1806_v41 = vpop.f32.mrb[1].mxu1  ;;  %v683_v44 = vadd.f32 %v1723_v43, %v679_v39 }
 0x3cb   : > { %692 = vrot.lane.b32.xlu0 %v690_v40, %s2165_s23  ;;  %v1726_v45 = vmul.f32 -1.442695, %v683_v44 }
 0x3cd   : > { %1967 = vpow2.f32 %v1726_v45 }
 0x3cf   : > { %712 = vperm.xlu0 %1960, %v1724_v42  }
 0x3d7   : > { %v1968_v46 = vpop.eup %1967 }
 0x3d8   : > { %v687_v47 = vadd.f32 1.0, %v1968_v46 }
 0x3da   : > { %1969 = vrcp.f32 %v687_v47 }
 0x3e4   : > { %v1970_v48 = vpop.eup %1969 }
 0x3e5   : > { %v702_v56 = vsub.f32 1.0, %v1970_v48  ;;  %v708_v59 = vmul.f32 %v1970_v48, %v598_v37 }
 0x43d   : > { %v693_v49 = vpop.permute.xlu0 %692 }
 0x43e   : > { %v695_v50 = vmul.f32 %v1970_v48, %v693_v49 }
 0x440   : > { %697 = vrot.lane.b32.xlu1 %v695_v50, %s2163_s28 }
 0x444   : > { %719 = vperm.xlu1 %1959, %v716_v51  }
 0x44e   : > { %v713_v55 = vpop.permute.xlu0 %712 }
 0x4b2   : > { %v698_v52 = vpop.permute.xlu1 %697 }
 0x4b3   : > { %v700_v53 = vadd.f32 %v1723_v43, %v698_v52 }
 0x4b5   : > { %1971 = vtanh.f32 %v700_v53 }
 0x4bf   : > { %v1972_v54 = vpop.eup %1971 }
 0x4c0   : > { %704 = vrot.lane.b32.xlu0 %v1972_v54, %s2166_s30 }
 0x4c3   : > { %v720_v61 = vpop.permute.xlu1 %719 }
 0x4c4   : > { %1077 = vrot.lane.b32.xlu0 %v1742_v58, %s2163_s28  ;;  %v722_v63 = vmul.f32 %v720_v61, %v598_v37  ;;  %v842_v37 = vsub.f32 1.0, %v1729_v34 }
 0x532   : > { %v705_v57 = vpop.permute.xlu0 %704 }
 0x533   : > { %v707_v60 = vmul.f32 %v705_v57, %v702_v56 }
 0x535   : > { %v709_v62 = vadd.f32 %v708_v59, %v707_v60 }
 0x536   : > { %v2437_v13 = vpop.permute.xlu0 %1077 }
 0x537   : > { %v2412_v0 = vmul.f32 %v713_v55, %v709_v62 }
 0x539   : > { %v2415_v1 = vadd.f32 %v722_v63, %v2412_v0 }
 0x53b   : > { %735 = vrot.lane.b32.xlu1 %v2415_v1, %s2166_s30 }
 0x5ad   : > { %v736_v7 = vpop.permute.xlu1 %735 }
 0x5ae   : > { %1812 = vmatmul.mubr.msk.f32.vlgmr.msra.gmra.mrb[2].mxu0 %vm469_vm2, %v736_v7 }
 0x5af   : > { %1863 = vmatpush3.bf16.msra.mxu0 %v2425_v6  ;;  %1825 = vmatprep.mubr.msk.f32.mxu0 %vm2161_vm1, %v2162_v5 }
 0x5b0   : > { %1867 = vmatprep.subr.bf16.mxu0 %v2160_v3 }
 0x5b2   : > { %1826 = vmatmul.mubr.msk.f32.vlgmr.msra.gmra.mrb[4].mxu0 %vm469_vm2, %v987_v8 }
 0x5b3   : > { %1869 = vmatpush3.bf16.msra.mxu0 %v2425_v6  ;;  %1839 = vmatprep.mubr.msk.f32.mxu0 %vm2161_vm1, %v2162_v5 }
 0x681   : > { %v805_v10 = vpop.f32.mrb[2].mxu0 }
 0x682   : > { %v816_v11 = vadd.f32 %v805_v10, %v2383_v9  ;;  %v1813_v12 = vpop.f32.mrb[3].mxu0  ;;  %v809_v18 = vadd.f32 %v1728_v17, %v805_v10 }
 0x684   : > { %818 = vrot.lane.b32.xlu1 %v816_v11, %s2165_s23  ;;  %v1731_v20 = vmul.f32 -1.442695, %v809_v18 }
 0x685   : > { %v1061_v14 = vpop.f32.mrb[4].mxu0 }
 0x686   : > { %v1080_v15 = vadd.f32 %v2437_v13, %v1061_v14  ;;  %v1827_v16 = vpop.f32.mrb[5].mxu0  ;;  %v1065_v21 = vadd.f32 %v1738_v19, %v1061_v14  ;;  %1973 = vpow2.f32 %v1731_v20 }
 0x688   : > { %1082 = vrot.lane.b32.xlu0 %v1080_v15, %s2165_s23  ;;  %v1741_v22 = vmul.f32 -1.442695, %v1065_v21  ;;  %v1745_v15 = vld [vmem:[%s2349_s12 + $0x10] sm:$0xff] }
 0x689   : > { %v1239_v21 = vsub.f32 1.0, %v1745_v15 }
 0x68a   : > { %1975 = vpow2.f32 %v1741_v22 }
 0x690   : > { %v1974_v23 = vpop.eup %1973 }
 0x691   : > { %v813_v24 = vadd.f32 1.0, %v1974_v23 }
 0x693   : > { %1977 = vrcp.f32 %v813_v24 }
 0x694   : > { %v1976_v25 = vpop.eup %1975 }
 0x695   : > { %v1069_v26 = vadd.f32 1.0, %v1976_v25 }
 0x697   : > { %1979 = vrcp.f32 %v1069_v26 }
 0x69d   : > { %v1978_v27 = vpop.eup %1977 }
 0x69e   : > { %v828_v49 = vsub.f32 1.0, %v1978_v27  ;;  %v834_v51 = vmul.f32 %v1978_v27, %v2415_v1 }
 0x6a1   : > { %v1980_v32 = vpop.eup %1979 }
 0x6a2   : > { %v1092_v55 = vsub.f32 1.0, %v1980_v32 }
 0x6f6   : > { %v819_v28 = vpop.permute.xlu1 %818 }
 0x6f7   : > { %v821_v30 = vmul.f32 %v1978_v27, %v819_v28 }
 0x6f9   : > { %823 = vrot.lane.b32.xlu1 %v821_v30, %s2163_s28 }
 0x6fa   : > { %v1083_v33 = vpop.permute.xlu0 %1082 }
 0x6fb   : > { %v1085_v35 = vmul.f32 %v1980_v32, %v1083_v33 }
 0x6fd   : > { %1112 = vperm.xlu1 %1959, %v1109_v31   ;;  %1087 = vrot.lane.b32.xlu0 %v1085_v35, %s2163_s28 }
 0x701   : > { %845 = vperm.xlu1 %1959, %v842_v37   ;;  %838 = vperm.xlu0 %1960, %v1729_v34  }
 0x705   : > { %1105 = vperm.xlu1 %1959, %v1739_v29  }
 0x709   : > { %1098 = vrot.lane.b32.xlu1 %v987_v8, %s2167_s11 }
 0x76b   : > { %v824_v38 = vpop.permute.xlu1 %823 }
 0x76c   : > { %v826_v39 = vadd.f32 %v1728_v17, %v824_v38 }
 0x76e   : > { %1981 = vtanh.f32 %v826_v39 }
 0x76f   : > { %v1088_v40 = vpop.permute.xlu0 %1087 }
 0x770   : > { %v1090_v41 = vadd.f32 %v1738_v19, %v1088_v40  ;;  %v1750_v40 = vld [vmem:[%s2349_s12 + $0x8] sm:$0xff] }
 0x772   : > { %1983 = vtanh.f32 %v1090_v41  ;;  %v1749_v41 = vld [vmem:[%s2339_s13 + $0x8] sm:$0xff] }
 0x778   : > { %v1982_v42 = vpop.eup %1981 }
 0x779   : > { %830 = vrot.lane.b32.xlu0 %v1982_v42, %s2166_s30 }
 0x77c   : > { %v1984_v43 = vpop.eup %1983  ;;  %v1113_v44 = vpop.permute.xlu1 %1112 }
 0x77d   : > { %1094 = vrot.lane.b32.xlu0 %v1984_v43, %s2166_s30  ;;  %v1115_v45 = vmul.f32 %v1113_v44, %v987_v8 }
 0x780   : > { %v846_v46 = vpop.permute.xlu1 %845  ;;  %v839_v47 = vpop.permute.xlu0 %838 }
 0x781   : > { %1117 = vrot.lane.b32.xlu0 %v1115_v45, %s2167_s11  ;;  %v848_v57 = vmul.f32 %v846_v46, %v2415_v1 }
 0x784   : > { %v1106_v48 = vpop.permute.xlu1 %1105 }
 0x788   : > { %v1099_v53 = vpop.permute.xlu1 %1098 }
 0x789   : > { %v1101_v58 = vmul.f32 %v1980_v32, %v1099_v53 }
 0x7eb   : > { %v831_v50 = vpop.permute.xlu0 %830 }
 0x7ec   : > { %v833_v52 = vmul.f32 %v831_v50, %v828_v49  ;;  %v1365_v49 = vsub.f32 1.0, %v1750_v40 }
 0x7ee   : > { %v835_v54 = vadd.f32 %v834_v51, %v833_v52 }
 0x7ef   : > { %v1095_v56 = vpop.permute.xlu0 %1094 }
 0x7f0   : > { %v2454_v59 = vmul.f32 %v839_v47, %v835_v54  ;;  %v1097_v60 = vmul.f32 %v1095_v56, %v1092_v55  ;;  %v1733_v54 = vld [vmem:[%s2334_s22 + $0x18] sm:$0xff] }
 0x7f2   : > { %v1102_v61 = vadd.f32 %v1101_v58, %v1097_v60  ;;  %v2457_v62 = vadd.f32 %v848_v57, %v2454_v59 }
 0x7f3   : > { %v1118_v2 = vpop.permute.xlu0 %1117 }
 0x7f4   : > { %v2459_v63 = vmul.f32 %v1106_v48, %v1102_v61  ;;  %861 = vrot.lane.b32.xlu1 %v2457_v62, %s2166_s30 }
 0x7f6   : > { %v1120_v4 = vadd.f32 %v1118_v2, %v2459_v63 }
 0x7f8   : > { %1132 = vrot.lane.b32.xlu0 %v1120_v4, %s2166_s30 }
 0x866   : > { %v862_v1 = vpop.permute.xlu1 %861 }
 0x867   : > { %1819 = vmatmul.mubr.msk.f32.vlgmr.msra.gmra.mrb[2].mxu1 %vm469_vm2, %v862_v1 }
 0x868   : > { %1866 = vmatpush3.bf16.msra.mxu1 %v2425_v6  ;;  %1832 = vmatprep.mubr.msk.f32.mxu1 %vm2161_vm1, %v2162_v5 }
 0x869   : > { %1870 = vmatprep.subr.bf16.mxu1 %v2160_v3  ;;  %v1744_v3 = vld [vmem:[%s2339_s13 + $0x10] sm:$0xff] }
 0x86a   : > { %v1133_v7 = vpop.permute.xlu0 %1132 }
 0x86b   : > { %1833 = vmatmul.mubr.msk.f32.vlgmr.msra.gmra.mrb[4].mxu1 %vm469_vm2, %v1133_v7 }
 0x86c   : > { %1872 = vmatpush3.bf16.msra.mxu1 %v2425_v6  ;;  %1846 = vmatprep.mubr.msk.f32.mxu1 %vm2161_vm1, %v2162_v5 }
 0x93a   : > { %v2474_v8 = vpop.f32.mrb[2].mxu1 }
 0x93b   : > { %v1820_v10 = vpop.f32.mrb[3].mxu1  ;;  %v942_v53 = vadd.f32 %v2474_v8, %v2383_v9  ;;  %v935_v55 = vadd.f32 %v1733_v54, %v2474_v8 }
 0x93d   : > { %v1736_v56 = vmul.f32 -1.442695, %v935_v55 }
 0x93e   : > { %v1202_v11 = vpop.f32.mrb[4].mxu1 }
 0x93f   : > { %v1213_v12 = vadd.f32 %v1202_v11, %v2437_v13  ;;  %v1834_v14 = vpop.f32.mrb[5].mxu1  ;;  %v1206_v16 = vadd.f32 %v1744_v3, %v1202_v11 }
 0x941   : > { %1215 = vrot.lane.b32.xlu1 %v1213_v12, %s2165_s23  ;;  %v1747_v17 = vmul.f32 -1.442695, %v1206_v16  ;;  %v1380_v16 = vld [vmem:[%s2349_s12] sm:$0xff] }
 0x943   : > { %1985 = vpow2.f32 %v1747_v17 }
 0x945   : > { %1235 = vperm.xlu1 %1959, %v1745_v15  }
 0x94d   : > { %v1986_v18 = vpop.eup %1985 }
 0x94e   : > { %v1210_v6 = vadd.f32 1.0, %v1986_v18 }
 0x950   : > { %1987 = vrcp.f32 %v1210_v6 }
 0x95a   : > { %v1988_v19 = vpop.eup %1987 }
 0x95b   : > { %v1225_v26 = vsub.f32 1.0, %v1988_v19  ;;  %v1231_v28 = vmul.f32 %v1988_v19, %v1120_v4 }
 0x9b3   : > { %v1216_v5 = vpop.permute.xlu1 %1215 }
 0x9b4   : > { %v1218_v20 = vmul.f32 %v1988_v19, %v1216_v5 }
 0x9b6   : > { %1220 = vrot.lane.b32.xlu0 %v1218_v20, %s2163_s28 }
 0x9ba   : > { %1242 = vperm.xlu0 %1960, %v1239_v21  }
 0x9c4   : > { %v1236_v25 = vpop.permute.xlu1 %1235 }
 0xa28   : > { %v1221_v22 = vpop.permute.xlu0 %1220 }
 0xa29   : > { %v1223_v23 = vadd.f32 %v1744_v3, %v1221_v22  ;;  %v1734_v3 = vld [vmem:[%s2344_s19 + $0x18] sm:$0xff] }
 0xa2b   : > { %1989 = vtanh.f32 %v1223_v23 }
 0xa35   : > { %v1990_v24 = vpop.eup %1989 }
 0xa36   : > { %1227 = vrot.lane.b32.xlu1 %v1990_v24, %s2166_s30 }
 0xa39   : > { %v1243_v30 = vpop.permute.xlu0 %1242 }
 0xa3a   : > { %v1245_v32 = vmul.f32 %v1243_v30, %v1120_v4 }
 0xaa8   : > { %v1228_v27 = vpop.permute.xlu1 %1227 }
 0xaa9   : > { %v1230_v29 = vmul.f32 %v1228_v27, %v1225_v26  ;;  %v1379_v27 = vld [vmem:[%s2339_s13] sm:$0xff] }
 0xaab   : > { %v1232_v31 = vadd.f32 %v1231_v28, %v1230_v29 }
 0xaad   : > { %v2482_v33 = vmul.f32 %v1236_v25, %v1232_v31 }
 0xaaf   : > { %v1246_v34 = vadd.f32 %v1245_v32, %v2482_v33 }
 0xab1   : > { %1258 = vrot.lane.b32.xlu0 %v1246_v34, %s2166_s30 }
 0xb23   : > { %v1259_v35 = vpop.permute.xlu0 %1258 }
 0xb24   : > { %1840 = vmatmul.mubr.msk.f32.vlgmr.msra.gmra.mrb[6].mxu0 %vm469_vm2, %v1259_v35  ;;  %v1489_v35 = vsub.f32 1.0, %v1380_v16 }
 0xbf7   : > { %v1328_v37 = vpop.f32.mrb[6].mxu0 }
 0xbf8   : > { %v1339_v38 = vadd.f32 %v1328_v37, %v2437_v13  ;;  %v1841_v39 = vpop.f32.mrb[7].mxu0  ;;  %v1332_v42 = vadd.f32 %v1749_v41, %v1328_v37 }
 0xbfa   : > { %1341 = vrot.lane.b32.xlu1 %v1339_v38, %s2165_s23  ;;  %v1752_v43 = vmul.f32 -1.442695, %v1332_v42 }
 0xbfc   : > { %1991 = vpow2.f32 %v1752_v43 }
 0xbfe   : > { %1361 = vperm.xlu1 %1959, %v1750_v40  }
 0xc06   : > { %v1992_v44 = vpop.eup %1991 }
 0xc07   : > { %v1336_v45 = vadd.f32 1.0, %v1992_v44 }
 0xc09   : > { %1993 = vrcp.f32 %v1336_v45 }
 0xc13   : > { %v1994_v46 = vpop.eup %1993 }
 0xc14   : > { %v1351_v61 = vsub.f32 1.0, %v1994_v46  ;;  %v1357_v4 = vmul.f32 %v1994_v46, %v1246_v34 }
 0xc6c   : > { %v1342_v47 = vpop.permute.xlu1 %1341 }
 0xc6d   : > { %v1344_v48 = vmul.f32 %v1994_v46, %v1342_v47 }
 0xc6f   : > { %1346 = vrot.lane.b32.xlu0 %v1344_v48, %s2163_s28 }
 0xc73   : > { %1368 = vperm.xlu0 %1960, %v1365_v49  }
 0xc7d   : > { %v1362_v60 = vpop.permute.xlu1 %1361 }
 0xce1   : > { %v1347_v50 = vpop.permute.xlu0 %1346 }
 0xce2   : > { %v1349_v51 = vadd.f32 %v1749_v41, %v1347_v50 }
 0xce4   : > { %1995 = vtanh.f32 %v1349_v51 }
 0xce5   : > { %1997 = vpow2.f32 %v1736_v56 }
 0xcee   : > { %v1996_v52 = vpop.eup %1995 }
 0xcef   : > { %1353 = vrot.lane.b32.xlu1 %v1996_v52, %s2166_s30  ;;  %v1998_v57 = vpop.eup %1997 }
 0xcf0   : > { %v939_v58 = vadd.f32 1.0, %v1998_v57 }
 0xcf2   : > { %1999 = vrcp.f32 %v939_v58  ;;  %v1369_v7 = vpop.permute.xlu0 %1368 }
 0xcf3   : > { %944 = vrot.lane.b32.xlu1 %v942_v53, %s2165_s23  ;;  %v1371_v12 = vmul.f32 %v1369_v7, %v1246_v34  ;;  %v968_v34 = vsub.f32 1.0, %v1734_v3 }
 0xcfc   : > { %v2000_v9 = vpop.eup %1999 }
 0xcfd   : > { %v954_v38 = vsub.f32 1.0, %v2000_v9  ;;  %v960_v40 = vmul.f32 %v2000_v9, %v2457_v62 }
 0xd61   : > { %v1354_v2 = vpop.permute.xlu1 %1353 }
 0xd62   : > { %v1356_v1 = vmul.f32 %v1354_v2, %v1351_v61 }
 0xd64   : > { %v1358_v10 = vadd.f32 %v1357_v4, %v1356_v1 }
 0xd65   : > { %v945_v11 = vpop.permute.xlu1 %944 }
 0xd66   : > { %v1364_v14 = vmul.f32 %v1362_v60, %v1358_v10  ;;  %v947_v15 = vmul.f32 %v2000_v9, %v945_v11 }
 0xd68   : > { %949 = vrot.lane.b32.xlu1 %v947_v15, %s2163_s28  ;;  %v2499_v8 = vadd.f32 %v1371_v12, %v1364_v14 }
 0xd6a   : > { %1382 = vrot.lane.b32.xlu0 %v2499_v8, %s2166_s30 }
 0xd6c   : > { %964 = vperm.xlu1 %1959, %v1734_v3  }
 0xd70   : > { %1485 = vperm.xlu1 %1959, %v1380_v16  }
 0xdda   : > { %v950_v17 = vpop.permute.xlu1 %949 }
 0xddb   : > { %v952_v18 = vadd.f32 %v1733_v54, %v950_v17 }
 0xddc   : > { %v1383_v6 = vpop.permute.xlu0 %1382 }
 0xddd   : > { %2001 = vtanh.f32 %v952_v18  ;;  %1847 = vmatmul.mubr.msk.f32.vlgmr.msra.gmra.mrb[6].mxu1 %vm469_vm2, %v1383_v6 }
 0xde7   : > { %v2002_v19 = vpop.eup %2001 }
 0xde8   : > { %956 = vrot.lane.b32.xlu1 %v2002_v19, %s2166_s30 }
 0xdeb   : > { %v965_v5 = vpop.permute.xlu1 %964 }
 0xdec   : > { %600 = vrot.lane.b32.xlu1 %v2393_v36, %s2166_s30 }
 0xdef   : > { %v1486_v20 = vpop.permute.xlu1 %1485 }
 0xdf0   : > { %851 = vrot.lane.b32.xlu1 %v2454_v59, %s2166_s30 }
 0xe5a   : > { %v957_v21 = vpop.permute.xlu1 %956 }
 0xe5b   : > { %v959_v39 = vmul.f32 %v957_v21, %v954_v38 }
 0xe5d   : > { %v961_v42 = vadd.f32 %v960_v40, %v959_v39 }
 0xe5e   : > { %v601_v22 = vpop.permute.xlu1 %600 }
 0xe5f   : > { %603 = vst.msk [vmem:[%s2351_s8] sm:$0xff] %vm469_vm2, %v601_v22  ;;  %v967_v44 = vmul.f32 %v965_v5, %v961_v42 }
 0xe62   : > { %v852_v23 = vpop.permute.xlu1 %851 }
 0xe63   : > { %1732 = vst.msk [vmem:[%s2351_s8 + $0x10] sm:$0xff] %vm469_vm2, %v852_v23 }
 0xeb0   : > { %v1452_v24 = vpop.f32.mrb[6].mxu1 }
 0xeb1   : > { %v1463_v25 = vadd.f32 %v1452_v24, %v2437_v13  ;;  %v1848_v26 = vpop.f32.mrb[7].mxu1  ;;  %v1456_v36 = vadd.f32 %v1452_v24, %v1379_v27 }
 0xeb3   : > { %1465 = vrot.lane.b32.xlu0 %v1463_v25, %s2165_s23  ;;  %v1755_v28 = vmul.f32 -1.442695, %v1456_v36 }
 0xeb5   : > { %2003 = vpow2.f32 %v1755_v28 }
 0xebf   : > { %v2004_v59 = vpop.eup %2003 }
 0xec0   : > { %v1460_v29 = vadd.f32 1.0, %v2004_v59 }
 0xec2   : > { %2005 = vrcp.f32 %v1460_v29 }
 0xecc   : > { %v2006_v30 = vpop.eup %2005 }
 0xecd   : > { %v1481_v49 = vmul.f32 %v2006_v30, %v2499_v8 }
 0xf25   : > { %v1466_v31 = vpop.permute.xlu0 %1465 }
 0xf26   : > { %v1468_v32 = vmul.f32 %v2006_v30, %v1466_v31 }
 0xf28   : > { %1470 = vrot.lane.b32.xlu0 %v1468_v32, %s2163_s28 }
 0xf2c   : > { %971 = vperm.xlu0 %1960, %v968_v34  }
 0xf30   : > { %1492 = vperm.xlu0 %1960, %v1489_v35  }
 0xf9a   : > { %v1471_v13 = vpop.permute.xlu0 %1470 }
 0xf9b   : > { %v1473_v37 = vadd.f32 %v1471_v13, %v1379_v27 }
 0xf9d   : > { %2007 = vtanh.f32 %v1473_v37 }
 0xfa7   : > { %v2008_v41 = vpop.eup %2007 }
 0xfa8   : > { %1477 = vrot.lane.b32.xlu0 %v2008_v41, %s2166_s30 }
 0xfab   : > { %v972_v43 = vpop.permute.xlu0 %971 }
 0xfac   : > { %v974_v45 = vmul.f32 %v972_v43, %v2457_v62  ;;  %725 = vrot.lane.b32.xlu0 %v2412_v0, %s2166_s30  ;;  %v1475_v62 = vsub.f32 1.0, %v2006_v30 }
 0xfae   : > { %v975_v46 = vadd.f32 %v974_v45, %v967_v44 }
 0xfaf   : > { %v1493_v47 = vpop.permute.xlu0 %1492 }
 0xfb0   : > { %977 = vrot.lane.b32.xlu0 %v967_v44, %s2166_s30  ;;  %983 = vrot.lane.b32.xlu1 %v975_v46, %s2166_s30  ;;  %v1495_v52 = vmul.f32 %v1493_v47, %v2499_v8 }
 0xfb4   : > { %1122 = vrot.lane.b32.xlu0 %v2459_v63, %s2166_s30  ;;  %1248 = vrot.lane.b32.xlu1 %v2482_v33, %s2166_s30 }
 0xfb8   : > { %1374 = vrot.lane.b32.xlu0 %v1364_v14, %s2166_s30 }
0x101a   : > { %v1478_v48 = vpop.permute.xlu0 %1477 }
0x101b   : > { %v1480_v0 = vmul.f32 %v1478_v48, %v1475_v62 }
0x101d   : > { %v1482_v50 = vadd.f32 %v1481_v49, %v1480_v0 }
0x101e   : > { %v726_v51 = vpop.permute.xlu0 %725 }
0x101f   : > { %1727 = vst.msk [vmem:[%s2351_s8 + $0x8] sm:$0xff] %vm469_vm2, %v726_v51  ;;  %v1488_v63 = vmul.f32 %v1486_v20, %v1482_v50 }
0x1021   : > { %1498 = vrot.lane.b32.xlu1 %v1488_v63, %s2166_s30  ;;  %v1496_v33 = vadd.f32 %v1495_v52, %v1488_v63 }
0x1022   : > { %v984_v53 = vpop.permute.xlu1 %983  ;;  %v978_v54 = vpop.permute.xlu0 %977 }
0x1023   : > { %986 = vst.msk [vmem:[#allocation2] sm:$0xff] %vm469_vm2, %v984_v53  ;;  %1737 = vst.msk [vmem:[%s2351_s8 + $0x18] sm:$0xff] %vm469_vm2, %v978_v54  ;;  %1503 = vrot.lane.b32.xlu0 %v1496_v33, %s2166_s30 }
0x1026   : > { %v1249_v55 = vpop.permute.xlu1 %1248  ;;  %v1123_v56 = vpop.permute.xlu0 %1122 }
0x1027   : > { %1748 = vst.msk [vmem:[%s2353_s15 + $0x10] sm:$0xff] %vm469_vm2, %v1249_v55  ;;  %1743 = vst.msk [vmem:[%s2353_s15 + $0x18] sm:$0xff] %vm469_vm2, %v1123_v56 }
0x102a   : > { %v1375_v57 = vpop.permute.xlu0 %1374  ;;  %v1511_v61 = vld [vmem:[#allocation2] sm:$0xff] (!%p1756_p7) }
0x102b   : > { %1753 = vst.msk [vmem:[%s2353_s15 + $0x8] sm:$0xff] %vm469_vm2, %v1375_v57  ;;  %1512 = vst.msk [vmem:[#allocation8] sm:$0xff] (!%p1756_p7), %vm469_vm2, %v1511_v61 }
0x1090   : > { %1510 = sbr.rel (%p1756_p7) target bundleno = 4255 (0x109f), region = 60 }
0x1093   : > { %v1499_v58 = vpop.permute.xlu1 %1498 }
0x1094   : > { %1501 = vst.msk [vmem:[%s2353_s15] sm:$0xff] %vm469_vm2, %v1499_v58 }
0x1095   : > { %v1504_v60 = vpop.permute.xlu0 %1503 }
0x1096   : > { %1506 = vst.msk [vmem:[#allocation3] sm:$0xff] %vm469_vm2, %v1504_v60 }
0x109d   : > { %v1513_v2 = vld [vmem:[#allocation3] sm:$0xff] }
0x109e   : > { %1515 = vst.msk [vmem:[#allocation8 + $0x8] sm:$0xff] %vm469_vm2, %v1513_v2 }
0x109f PF: > { %s1521_s19 = sand.u32 1, %s2264_s20   ;;  %s2726_s22 = ssub.s32 1, %s2264_s20 }
0x10a0   : > { %s1768_s13 = sshll.u32 %s2726_s22, 9  ;;  %s1552_s12 = sshll.u32 %s2353_s15, 4  ;;  %s2561_s12 = int_to_ptr.vmem [resolvable:$true] %s1552_s12 }
0x10a1   : > { %s2559_s28 = scalar_lea.hbm %s2692_s9, %s1768_s13  ;;  %s2563_s23 = scalar_lea.sflag [#allocation7], %s1521_s19 }
0x10a2   : > { %s2009_s30 = scalar_lea.vmem %s2561_s12, 512  ;;  %s2168_s11 = smov [#allocation6]  }
0x10a3   : > { %p2010_p8 = scmp.ne.s32.totalorder %s2561_s12, %s2009_s30  ;;  %s2013_s25 = sshll.u32 %s2168_s11, 4  ;;  %s2014_s25 = int_to_ptr.vmem [resolvable:$false] %s2013_s25 }
0x10a4   : > { %s2015_s15 = scalar_lea.vmem %s2014_s25, 1024  ;;  %p2016_p13 = scmp.lt.s32.totalorder %s2561_s12, %s2014_s25 }
0x10a5   : > { %p2011_p9 = pnand %p2010_p8, %p2312_p11  ;;  %p2017_p0 = scmp.lt.s32.totalorder %s2015_s15, %s2009_s30 }
0x10a7   : > { %p2012_p10 = pneg %p2011_p9  ;;  %p2018_p1 = por %p2017_p0, %p2016_p13 }
0x10a9   : > { %p2019_p3 = pnand %p2018_p1, %p2012_p10 }
0x10ab   : > { %2022 = shalt.err (!%p2019_p3)
}
0x10ac   : > { %s2023_s29 = scalar_lea.hbm %s2559_s28, 512  ;;  %s2027_s18 = scalar_lea.hbm %s2692_s9, 1024 }
0x10ad   : > { %p2024_p4 = scmp.ne.s32.totalorder %s2559_s28, %s2023_s29  ;;  %p2028_p9 = scmp.lt.u32.totalorder %s2559_s28, %s2692_s9 }
0x10ae   : > { %p2029_p10 = scmp.lt.u32.totalorder %s2027_s18, %s2023_s29  ;;  %p2031_p0 = scmp.lt.u32.totalorder %s2023_s29, %s2559_s28 }
0x10af   : > { %p2025_p7 = pnand %p2024_p4, %p2312_p11 }
0x10b0   : > { %p2030_p13 = por %p2029_p10, %p2028_p9 }
0x10b1   : > { %p2026_p8 = pneg %p2025_p7 }
0x10b2   : > { %p2032_p1 = por %p2031_p0, %p2030_p13 }
0x10b4   : > { %p2033_p3 = pnand %p2032_p1, %p2026_p8 }
0x10b6   : > { %2036 = shalt.err (!%p2033_p3)
}
0x10b7   : > { %s2169_s22 = smov 128   ;;  %s2170_s13 = smov 8  }
0x10b8   : > { %1874 = dma.vmem_to_hbm [thread:$0]  (%p2312_p11), %s2561_s12, 512, %s2559_s28, %s2563_s23, %s2169_s22, %s2169_s22, %s2170_s13  }
0x10b9   : > { %s1767_s21 = sshll.u32 %s2264_s20, 9  ;;  %s2727_s11 = sld [smem:[#allocation22_spill]] }
0x10ba   : > { %s1535_s15 = sshll.u32 %s2351_s8, 4  ;;  %s2728_s29 = sand.u32 1, %s2149_s17   ;;  %s2597_s15 = int_to_ptr.vmem [resolvable:$true] %s1535_s15 }
0x10bb   : > { %s2601_s14 = scalar_lea.sflag [#allocation5], %s2728_s29  ;;  %s2037_s24 = scalar_lea.vmem %s2597_s15, 512 }
0x10bc   : > { %p2038_p4 = scmp.ne.s32.totalorder %s2597_s15, %s2037_s24  ;;  %s2171_s12 = smov [#allocation4]  }
0x10bd   : > { %s2041_s28 = sshll.u32 %s2171_s12, 4  ;;  %s2042_s28 = int_to_ptr.vmem [resolvable:$false] %s2041_s28 }
0x10be   : > { %p2039_p7 = pnand %p2038_p4, %p2289_p5  ;;  %s2043_s23 = scalar_lea.vmem %s2042_s28, 1024 }
0x10bf   : > { %s2594_s25 = scalar_lea.hbm %s2727_s11, %s1767_s21  ;;  %p2044_p8 = scmp.lt.s32.totalorder %s2597_s15, %s2042_s28 }
0x10c0   : > { %p2040_p11 = pneg %p2039_p7  ;;  %p2045_p9 = scmp.lt.s32.totalorder %s2043_s23, %s2037_s24 }
0x10c2   : > { %p2046_p10 = por %p2045_p9, %p2044_p8 }
0x10c4   : > { %p2047_p13 = pnand %p2046_p10, %p2040_p11 }
0x10c6   : > { %2050 = shalt.err (!%p2047_p13)
}
0x10c7   : > { %s2051_s8 = scalar_lea.hbm %s2594_s25, 512  ;;  %s2055_s10 = scalar_lea.hbm %s2727_s11, 1024 }
0x10c8   : > { %p2052_p0 = scmp.ne.s32.totalorder %s2594_s25, %s2051_s8  ;;  %p2056_p4 = scmp.lt.u32.totalorder %s2594_s25, %s2727_s11 }
0x10c9   : > { %p2057_p7 = scmp.lt.u32.totalorder %s2055_s10, %s2051_s8  ;;  %p2059_p8 = scmp.lt.u32.totalorder %s2051_s8, %s2594_s25 }
0x10ca   : > { %p2053_p1 = pnand %p2052_p0, %p2289_p5 }
0x10cb   : > { %p2058_p11 = por %p2057_p7, %p2056_p4 }
0x10cc   : > { %p2054_p3 = pneg %p2053_p1 }
0x10cd   : > { %p2060_p9 = por %p2059_p8, %p2058_p11 }
0x10cf   : > { %p2061_p10 = pnand %p2060_p9, %p2054_p3 }
0x10d1   : > { %2064 = shalt.err (!%p2061_p10)
}
0x10d2   : > { %1873 = dma.vmem_to_hbm [thread:$0]  (%p2289_p5), %s2597_s15, 512, %s2594_s25, %s2601_s14, %s2169_s22, %s2169_s22, %s2170_s13  }
0x10d3   : > { %s2172_s26 = smov [#allocation8]  }
0x10d4   : > { %s1565_s30 = sshll.u32 %s2172_s26, 4  ;;  %s1566_s30 = int_to_ptr.vmem [resolvable:$true] %s1565_s30 }
0x10d5   : > { %s2065_s29 = scalar_lea.vmem %s1566_s30, 256  ;;  %p2072_p3 = scmp.lt.s32.totalorder %s1566_s30, %s1566_s30 }
0x10d6   : > { %p2066_p13 = scmp.ne.s32.totalorder %s1566_s30, %s2065_s29  ;;  %p2073_p4 = scmp.lt.s32.totalorder %s2065_s29, %s2065_s29 }
0x10d8   : > { %p2067_p0 = pnand %p2066_p13, %p237_p2  ;;  %p2074_p7 = por %p2073_p4, %p2072_p3 }
0x10da   : > { %p2068_p1 = pneg %p2067_p0 }
0x10dc   : > { %p2075_p11 = pnand %p2074_p7, %p2068_p1 }
0x10de   : > { %2078 = shalt.err (!%p2075_p11)
}
0x10df   : > { %s2729_s12 = sld [smem:[#allocation23_spill]] }
0x10e5   : > { %s2079_s28 = scalar_lea.hbm %s2729_s12, 256 }
0x10e6   : > { %p2080_p5 = scmp.ne.s32.totalorder %s2729_s12, %s2079_s28  ;;  %p2085_p10 = scmp.lt.u32.totalorder %s2079_s28, %s2729_s12 }
0x10e8   : > { %p2081_p8 = pnand %p2080_p5, %p237_p2 }
0x10ea   : > { %p2082_p9 = pneg %p2081_p8 }
0x10ec   : > { %p2087_p13 = pnand %p2085_p10, %p2082_p9 }
0x10ee   : > { %2090 = shalt.err (!%p2087_p13)
}
0x10ef   : > { %1876 = dma.vmem_to_hbm [thread:$0]  (%p237_p2), %s1566_s30, 256, %s2729_s12, [#allocation7], %s2169_s22, %s2169_s22, %s2170_s13  }
0x10f0   : > { %2120 = dma.done.wait (%p237_p2), [#allocation7], 256  }
0x10f1   : > { %2122 = vsyncadd (%p237_p2), [#allocation7], 4294967040 }
0x10f2 PF: > { %s2730_s18 = sld [smem:[#allocation16_spill]]  ;;  %s2731_s10 = sld [smem:[#allocation14_spill]] }
0x10f8   : > { %p1890_p0 = scmp.ge.s32.totalorder %s2730_s18, 2  ;;  %s1584_s21 = sand.u32 1, %s2731_s10  }
0x10f9   : > { %s1585_s26 = scalar_lea.sflag [#allocation5], %s1584_s21 }
0x10fa   : > { %p1882_p1 = pnand %p1890_p0, %p2295_p6 }
0x10fc   : > { %2124 = dma.done.wait (!%p1882_p1), %s1585_s26, 512  }
0x10fd   : > { %2126 = vsyncadd (!%p1882_p1), %s1585_s26, 4294966784  ;;  %s2733_s29 = sadd.s32 4294967294, %s2730_s18   ;;  %p1885_p3 = pnand %p1890_p0, %p2318_p12 }
0x10fe   : > { %s1593_s22 = sand.u32 1, %s2733_s29  }
0x10ff   : > { %s1594_s13 = scalar_lea.sflag [#allocation7], %s1593_s22 }
0x1100   : > { %2128 = dma.done.wait (!%p1885_p3), %s1594_s13, 512  }
0x1101   : > { %2130 = vsyncadd (!%p1885_p3), %s1594_s13, 4294966784  ;;  %s2735_s19 = sld [smem:[#allocation17_spill]]  ;;  %s2736_s13 = sld [smem:[#allocation12_spill]] }
0x1102   : > { %s2737_s14 = sld [smem:[#allocation13_spill]]  ;;  %s2738_s15 = sld [smem:[#allocation20_spill]] }
0x1103   : > { %s2739_s20 = sld [smem:[#allocation15_spill]]  ;;  %s2740_s18 = sld [smem:[#allocation18_spill]] }
0x1104   : > { %s2741_s16 = smov %s2149_s17 }
0x1107   : > { %p24_p2 = scmp.ge.s32.totalorder %s2735_s19, 4  }
0x1109   : > { %s2742_s17 = smov %s2739_s20  ;;  %26 = sbr.rel (!%p24_p2) target bundleno = 10 (0xa), region = 148 }
0x1110   :  { %1599 = vsyncpa [#allocation5], 1 }
0x1111   :  { %1601 = vsyncpa [#allocation5 + $0x1], 1 }
0x1112   :  { %1602 = vsyncpa [#allocation7], 1 }
0x1113   :  { %1604 = vsyncpa [#allocation7 + $0x1], 1 }

</bundles_post_ra>
